<compile_context>
chip_gen: v7x
topology: tpu7x:2x2x1
jax: 0.10.0
libtpu: 0.0.40
codegen_flags: <defaults>
</compile_context>

<pallas_src>
import jax
import jax.numpy as jnp
from jax import lax
from jax.experimental import pallas as pl
from jax.experimental.pallas import tpu as pltpu


def _gelu_exact(x):
    # PyTorch nn.GELU() default = exact erf GELU.  erf via Abramowitz-Stegun
    # 7.1.26 (max abs err ~1.5e-7) using only Mosaic-lowerable ops.
    z = x * 0.7071067811865476
    s = jnp.where(z >= 0.0, 1.0, -1.0)
    a = jnp.abs(z)
    t = 1.0 / (1.0 + 0.3275911 * a)
    poly = t * (0.254829592 + t * (-0.284496736 + t * (1.421413741
             + t * (-1.453152027 + t * 1.061405429))))
    erf = s * (1.0 - poly * jnp.exp(-a * a))
    return 0.5 * x * (1.0 + erf)


# --------------------------- embed kernel -----------------------------------
def _conv3(x, w_ref):
    # k=3 / s=1 / p=1 Conv1d over time as 3 accumulated MXU matmuls.
    # x: (T, Cin) value; w_ref: (3, Cin, Cout) ref (tap-major).  Shifted taps
    # are built with pltpu.roll on the sublane axis (XLU slot, overlaps MXU)
    # plus boundary zeroing -- no misaligned slices, no concat slab.
    T = x.shape[0]
    row = lax.broadcasted_iota(jnp.int32, x.shape, 0)
    x_prev = jnp.where(row == 0, 0.0, pltpu.roll(x, shift=1, axis=0))
    x_next = jnp.where(row == T - 1, 0.0, pltpu.roll(x, shift=T - 1, axis=0))
    return (jnp.dot(x_prev, w_ref[0], preferred_element_type=jnp.float32)
            + jnp.dot(x, w_ref[1], preferred_element_type=jnp.float32)
            + jnp.dot(x_next, w_ref[2], preferred_element_type=jnp.float32))


def embed_kernel(x_ref, w1_ref, b1_ref, s1_ref, t1_ref,
                 w2_ref, b2_ref, s2_ref, t2_ref, out_ref):
    # One grid step per batch element: Conv1+BN1+GELU+Conv2+BN2, all in VMEM.
    x = x_ref[0]                                               # (T, Cin)
    h1 = _conv3(x, w1_ref)
    h1 = _gelu_exact((h1 + b1_ref[...]) * s1_ref[...] + t1_ref[...])
    h2 = _conv3(h1, w2_ref)
    out_ref[0] = (h2 + b2_ref[...]) * s2_ref[...] + t2_ref[...]


def _embed(x, p):
    B, T, Cin = x.shape
    C1 = p['w1'].shape[2]
    C2 = p['w2'].shape[2]
    return pl.pallas_call(
        embed_kernel,
        out_shape=jax.ShapeDtypeStruct((B, T, C2), jnp.float32),
        grid=(B,),
        in_specs=[
            pl.BlockSpec((1, T, Cin), lambda b: (b, 0, 0)),
            pl.BlockSpec((3, Cin, C1), lambda b: (0, 0, 0)),
            pl.BlockSpec((1, C1), lambda b: (0, 0)),
            pl.BlockSpec((1, C1), lambda b: (0, 0)),
            pl.BlockSpec((1, C1), lambda b: (0, 0)),
            pl.BlockSpec((3, C1, C2), lambda b: (0, 0, 0)),
            pl.BlockSpec((1, C2), lambda b: (0, 0)),
            pl.BlockSpec((1, C2), lambda b: (0, 0)),
            pl.BlockSpec((1, C2), lambda b: (0, 0)),
        ],
        out_specs=pl.BlockSpec((1, T, C2), lambda b: (b, 0, 0)),
        compiler_params=pltpu.CompilerParams(dimension_semantics=("parallel",)),
    )(x, p['w1'], p['b1'], p['s1'], p['t1'],
      p['w2'], p['b2'], p['s2'], p['t2'])


# ----------------- fused BiLSTM (projection + recurrence) kernel ------------
def bilstm_kernel(x_ref, wih_ref, whh_ref, b_ref, len_ref, out_ref,
                  g_buf, h_st, c_st):
    # grid = (direction, time_chunk).  d=0: forward sweep, d=1: backward sweep
    # (chunks and rows within a chunk are visited in reverse time order).
    d = pl.program_id(0)
    ck = pl.program_id(1)
    nck = pl.num_programs(1)
    TC, B, F = x_ref.shape
    H = whh_ref.shape[1]
    tb = (1 - d) * ck + d * (nck - 1 - ck)        # absolute time-chunk index

    @pl.when(ck == 0)
    def _():
        h_st[...] = jnp.zeros((B, H), jnp.float32)
        c_st[...] = jnp.zeros((B, H), jnp.float32)

    # Fused input projection for the whole chunk: one bf16 MXU matmul with f32
    # accumulation; bias (b_ih + b_hh) folded in.  Result stays in VMEM.
    xb = x_ref[...].reshape(TC * B, F).astype(jnp.bfloat16)
    g = jnp.dot(xb, wih_ref[0], preferred_element_type=jnp.float32)
    g_buf[...] = g.reshape(TC, B, 4 * H) + b_ref[0]

    whh = whh_ref[0]                               # (H, 4H), hoisted
    lens = len_ref[...]                            # (B, 1) int32

    def step(i):
        t = (1 - d) * i + d * (TC - 1 - i)         # chunk-local row (time order)
        valid = (tb * TC + t) < lens               # (B, 1) bool
        pre = g_buf[t]                             # (B, 4H)
        h_prev = h_st[...]
        c_prev = c_st[...]
        # PyTorch LSTM gate order: i, f, g, o.  Recurrent matmul stays f32.
        z = pre + jnp.dot(h_prev, whh, preferred_element_type=jnp.float32)
        i_g = jax.nn.sigmoid(z[:, 0:H])
        f_g = jax.nn.sigmoid(z[:, H:2 * H])
        g_g = jnp.tanh(z[:, 2 * H:3 * H])
        o_g = jax.nn.sigmoid(z[:, 3 * H:4 * H])
        c_new = f_g * c_prev + i_g * g_g
        h_new = o_g * jnp.tanh(c_new)
        # packed-sequence semantics: padded steps freeze state, outputs are 0.
        h_st[...] = jnp.where(valid, h_new, h_prev)
        c_st[...] = jnp.where(valid, c_new, c_prev)
        out_ref[0, t] = jnp.where(valid, h_new, 0.0)

    @pl.loop(0, TC)
    def _(i):
        step(i)


def _bilstm_tm(xt, lens, p, chunk=64):
    # xt: (T2, B, F) time-major; lens: (B,) int32.  Returns (T2, B, 2H).
    T2, B, F = xt.shape
    H = p['whh'].shape[1]
    tc = min(chunk, T2)
    nck = pl.cdiv(T2, tc)
    T2p = nck * tc
    if T2p != T2:
        xt = jnp.pad(xt, ((0, T2p - T2), (0, 0), (0, 0)))
    lens2 = lens.reshape(B, 1).astype(jnp.int32)

    t_map = lambda d, c: ((1 - d) * c + d * (nck - 1 - c), 0, 0)
    out = pl.pallas_call(
        bilstm_kernel,
        out_shape=jax.ShapeDtypeStruct((2, T2p, B, H), jnp.float32),
        grid=(2, nck),
        in_specs=[
            pl.BlockSpec((tc, B, F), t_map),
            pl.BlockSpec((1, F, 4 * H), lambda d, c: (d, 0, 0)),
            pl.BlockSpec((1, H, 4 * H), lambda d, c: (d, 0, 0)),
            pl.BlockSpec((1, 1, 4 * H), lambda d, c: (d, 0, 0)),
            pl.BlockSpec((B, 1), lambda d, c: (0, 0)),
        ],
        out_specs=pl.BlockSpec(
            (1, tc, B, H),
            lambda d, c: (d, (1 - d) * c + d * (nck - 1 - c), 0, 0)),
        scratch_shapes=[pltpu.VMEM((tc, B, 4 * H), jnp.float32),
                        pltpu.VMEM((B, H), jnp.float32),
                        pltpu.VMEM((B, H), jnp.float32)],
        compiler_params=pltpu.CompilerParams(
            dimension_semantics=("parallel", "arbitrary")),
    )(xt, p['wih'], p['whh'], p['b'], lens2)
    # merge directions: fwd lanes 0:H, bwd lanes H:2H (one XLA pass).
    return jnp.concatenate([out[0, :T2], out[1, :T2]], axis=-1)


def _trunc_reshape_tm(xt, lens):
    # pBLSTM.trunc_reshape in time-major layout: drop trailing odd frame, pair
    # consecutive frames along features.
    T, B, F = xt.shape
    T2 = T // 2
    xt = xt[:T2 * 2].reshape(T2, 2, B, F).transpose(0, 2, 1, 3).reshape(T2, B, 2 * F)
    return xt, lens // 2


def encoder_forward(params, x, lens):
    # x: (B, T, input_size) float32; lens: (B,) int32
    B, T, _ = x.shape
    feats = _embed(x, params)                              # (B, T, 256)
    lens = jnp.minimum(lens, T).astype(jnp.int32)          # lens.clamp(max=T)
    xt = jnp.transpose(feats, (1, 0, 2))                   # time-major (T, B, 256)
    xt, lens = _trunc_reshape_tm(xt, lens)                 # (T//2, B, 512)
    h = _bilstm_tm(xt, lens, params['lstm1'])              # (T//2, B, 2H)
    # LockedDropout(0.4): no-op in eval mode
    xt2, lens = _trunc_reshape_tm(h, lens)                 # (T//4, B, 4H)
    h2 = _bilstm_tm(xt2, lens, params['lstm2'])            # (T//4, B, 2H)
    # LockedDropout(0.3): no-op in eval mode
    return jnp.transpose(h2, (1, 0, 2)), lens              # (B, T//4, 2H)


# --------------------------- parameter init ---------------------------------
def _fold_bn(gamma, beta, mean, var, eps=1e-5):
    scale = gamma / jnp.sqrt(var + eps)
    return scale, beta - mean * scale


def init_params(key, input_size, hidden_size):
    C1, C2 = 128, 256
    H = hidden_size
    keys = iter(jax.random.split(key, 32))

    def nrm(shape, s=0.08):
        return jax.random.normal(next(keys), shape, jnp.float32) * s

    def uni(shape, lo, hi):
        return jax.random.uniform(next(keys), shape, jnp.float32, lo, hi)

    p = {}
    # Conv1d weights stored tap-major: (3, Cin, Cout), tap k = w[k].
    p['w1'] = nrm((3, input_size, C1))
    p['b1'] = nrm((1, C1))
    p['s1'], p['t1'] = _fold_bn(uni((1, C1), 0.8, 1.2), nrm((1, C1)),
                                nrm((1, C1)), uni((1, C1), 0.5, 1.5))
    p['w2'] = nrm((3, C1, C2))
    p['b2'] = nrm((1, C2))
    p['s2'], p['t2'] = _fold_bn(uni((1, C2), 0.8, 1.2), nrm((1, C2)),
                                nrm((1, C2)), uni((1, C2), 0.5, 1.5))

    def lstm_params(in_dim):
        # per-direction stacks (0=fwd, 1=bwd); gate order i,f,g,o (PyTorch);
        # bias = b_ih + b_hh folded.  W_ih stored bf16 for the MXU projection.
        wih = jnp.stack([nrm((in_dim, 4 * H)), nrm((in_dim, 4 * H))])
        b = jnp.stack([nrm((1, 4 * H)) + nrm((1, 4 * H)),
                       nrm((1, 4 * H)) + nrm((1, 4 * H))])
        whh = jnp.stack([nrm((H, 4 * H)), nrm((H, 4 * H))])
        return {'wih': wih.astype(jnp.bfloat16), 'whh': whh, 'b': b}

    p['lstm1'] = lstm_params(2 * C2)          # pBLSTM(input=256) -> LSTM in = 512
    p['lstm2'] = lstm_params(4 * H)           # pBLSTM(input=2H)  -> LSTM in = 4H
    return p


if __name__ == "__main__":
    B, T, INPUT_SIZE, HIDDEN = 2, 16, 16, 32
    key = jax.random.PRNGKey(0)
    k_param, k_x = jax.random.split(key)
    params = init_params(k_param, INPUT_SIZE, HIDDEN)
    x = jax.random.normal(k_x, (B, T, INPUT_SIZE), jnp.float32)
    lens = jnp.array([T, 11], dtype=jnp.int32)

    fwd = jax.jit(encoder_forward)
    out, out_lens = fwd(params, x, lens)
    out = jax.block_until_ready(out)
    out_lens = jax.block_until_ready(out_lens)

    # pad_packed_sequence(batch_first=True) pads to max(lens) of the batch.
    max_len = int(jnp.max(out_lens))
    out = out[:, :max_len, :]
    assert out.shape == (B, max_len, 2 * HIDDEN), out.shape
    assert bool(jnp.all(jnp.isfinite(out)))
    print("KERNEL_OK")
</pallas_src>

<mosaic_0001>
module attributes {stable_mosaic.version = 11 : i64} {
  func.func @embed_kernel(%arg0: i32, %arg1: memref<1x16x16xf32, #tpu.memory_space<vmem>>, %arg2: memref<3x16x128xf32, #tpu.memory_space<vmem>>, %arg3: memref<1x128xf32, #tpu.memory_space<vmem>>, %arg4: memref<1x128xf32, #tpu.memory_space<vmem>>, %arg5: memref<1x128xf32, #tpu.memory_space<vmem>>, %arg6: memref<3x128x256xf32, #tpu.memory_space<vmem>>, %arg7: memref<1x256xf32, #tpu.memory_space<vmem>>, %arg8: memref<1x256xf32, #tpu.memory_space<vmem>>, %arg9: memref<1x256xf32, #tpu.memory_space<vmem>>, %arg10: memref<1x16x256xf32, #tpu.memory_space<vmem>>) attributes {dimension_semantics = [#tpu.dimension_semantics<parallel>], iteration_bounds = array<i64: 2>, scalar_prefetch = 0 : i64, scratch_operands = 0 : i64, tpu.core_type = #tpu.core_type<tc>, window_params = [{transform_indices = @transform_0, window_bounds = array<i64: 1, 16, 16>}, {pipeline_mode = #tpu.pipeline_mode<synchronous>, transform_indices = @transform_1, window_bounds = array<i64: 3, 16, 128>}, {pipeline_mode = #tpu.pipeline_mode<synchronous>, transform_indices = @transform_2, window_bounds = array<i64: 1, 128>}, {pipeline_mode = #tpu.pipeline_mode<synchronous>, transform_indices = @transform_3, window_bounds = array<i64: 1, 128>}, {pipeline_mode = #tpu.pipeline_mode<synchronous>, transform_indices = @transform_4, window_bounds = array<i64: 1, 128>}, {pipeline_mode = #tpu.pipeline_mode<synchronous>, transform_indices = @transform_5, window_bounds = array<i64: 3, 128, 256>}, {pipeline_mode = #tpu.pipeline_mode<synchronous>, transform_indices = @transform_6, window_bounds = array<i64: 1, 256>}, {pipeline_mode = #tpu.pipeline_mode<synchronous>, transform_indices = @transform_7, window_bounds = array<i64: 1, 256>}, {pipeline_mode = #tpu.pipeline_mode<synchronous>, transform_indices = @transform_8, window_bounds = array<i64: 1, 256>}, {transform_indices = @transform_9, window_bounds = array<i64: 1, 16, 256>}]} {
    %c0 = arith.constant 0 : index
    %c0_0 = arith.constant 0 : index
    %c0_1 = arith.constant 0 : index
    %0 = vector.load %arg1[%c0, %c0_0, %c0_1] : memref<1x16x16xf32, #tpu.memory_space<vmem>>, vector<1x16x16xf32>
    %1 = vector.shape_cast %0 : vector<1x16x16xf32> to vector<16x16xf32>
    %2 = tpu.iota {dimensions = array<i32: 0>} : vector<16x16xi32>
    %c0_i32 = arith.constant 0 : i32
    %3 = vector.broadcast %c0_i32 : i32 to vector<16x16xi32>
    %4 = arith.cmpi eq, %2, %3 : vector<16x16xi32>
    %c1_i32 = arith.constant 1 : i32
    %5 = tpu.dynamic_rotate %1 by %c1_i32 dim 0 : vector<16x16xf32>, i32 -> vector<16x16xf32>
    %cst = arith.constant 0.000000e+00 : f32
    %6 = vector.broadcast %cst : f32 to vector<16x16xf32>
    %7 = arith.select %4, %6, %5 : vector<16x16xi1>, vector<16x16xf32>
    %c15_i32 = arith.constant 15 : i32
    %8 = vector.broadcast %c15_i32 : i32 to vector<16x16xi32>
    %9 = arith.cmpi eq, %2, %8 : vector<16x16xi32>
    %c15_i32_2 = arith.constant 15 : i32
    %10 = tpu.dynamic_rotate %1 by %c15_i32_2 dim 0 : vector<16x16xf32>, i32 -> vector<16x16xf32>
    %cst_3 = arith.constant 0.000000e+00 : f32
    %11 = vector.broadcast %cst_3 : f32 to vector<16x16xf32>
    %12 = arith.select %9, %11, %10 : vector<16x16xi1>, vector<16x16xf32>
    %c0_4 = arith.constant 0 : index
    %c0_5 = arith.constant 0 : index
    %c0_6 = arith.constant 0 : index
    %13 = vector.load %arg2[%c0_4, %c0_5, %c0_6] : memref<3x16x128xf32, #tpu.memory_space<vmem>>, vector<1x16x128xf32>
    %14 = vector.shape_cast %13 : vector<1x16x128xf32> to vector<16x128xf32>
    %cst_7 = arith.constant dense<0.000000e+00> : vector<16x128xf32>
    %15 = tpu.matmul %7, %14, %cst_7 {dimension_numbers = #tpu.dot_dimension_numbers<[1], [0], [0], [1], [0, 0, 1, 1], [], []>} : vector<16x16xf32>, vector<16x128xf32>, vector<16x128xf32> -> vector<16x128xf32>
    %c1 = arith.constant 1 : index
    %c0_8 = arith.constant 0 : index
    %c0_9 = arith.constant 0 : index
    %16 = vector.load %arg2[%c1, %c0_8, %c0_9] : memref<3x16x128xf32, #tpu.memory_space<vmem>>, vector<1x16x128xf32>
    %17 = vector.shape_cast %16 : vector<1x16x128xf32> to vector<16x128xf32>
    %cst_10 = arith.constant dense<0.000000e+00> : vector<16x128xf32>
    %18 = tpu.matmul %1, %17, %cst_10 {dimension_numbers = #tpu.dot_dimension_numbers<[1], [0], [0], [1], [0, 0, 1, 1], [], []>} : vector<16x16xf32>, vector<16x128xf32>, vector<16x128xf32> -> vector<16x128xf32>
    %19 = arith.addf %15, %18 : vector<16x128xf32>
    %c2 = arith.constant 2 : index
    %c0_11 = arith.constant 0 : index
    %c0_12 = arith.constant 0 : index
    %20 = vector.load %arg2[%c2, %c0_11, %c0_12] : memref<3x16x128xf32, #tpu.memory_space<vmem>>, vector<1x16x128xf32>
    %21 = vector.shape_cast %20 : vector<1x16x128xf32> to vector<16x128xf32>
    %cst_13 = arith.constant dense<0.000000e+00> : vector<16x128xf32>
    %22 = tpu.matmul %12, %21, %cst_13 {dimension_numbers = #tpu.dot_dimension_numbers<[1], [0], [0], [1], [0, 0, 1, 1], [], []>} : vector<16x16xf32>, vector<16x128xf32>, vector<16x128xf32> -> vector<16x128xf32>
    %23 = arith.addf %19, %22 : vector<16x128xf32>
    %c0_14 = arith.constant 0 : index
    %c0_15 = arith.constant 0 : index
    %24 = vector.load %arg3[%c0_14, %c0_15] : memref<1x128xf32, #tpu.memory_space<vmem>>, vector<1x128xf32>
    %25 = vector.broadcast %24 : vector<1x128xf32> to vector<16x128xf32>
    %26 = arith.addf %23, %25 : vector<16x128xf32>
    %c0_16 = arith.constant 0 : index
    %c0_17 = arith.constant 0 : index
    %27 = vector.load %arg4[%c0_16, %c0_17] : memref<1x128xf32, #tpu.memory_space<vmem>>, vector<1x128xf32>
    %28 = vector.broadcast %27 : vector<1x128xf32> to vector<16x128xf32>
    %29 = arith.mulf %26, %28 : vector<16x128xf32>
    %c0_18 = arith.constant 0 : index
    %c0_19 = arith.constant 0 : index
    %30 = vector.load %arg5[%c0_18, %c0_19] : memref<1x128xf32, #tpu.memory_space<vmem>>, vector<1x128xf32>
    %31 = vector.broadcast %30 : vector<1x128xf32> to vector<16x128xf32>
    %32 = arith.addf %29, %31 : vector<16x128xf32>
    %cst_20 = arith.constant 0.707106769 : f32
    %33 = vector.broadcast %cst_20 : f32 to vector<16x128xf32>
    %34 = arith.mulf %32, %33 : vector<16x128xf32>
    %cst_21 = arith.constant 0.000000e+00 : f32
    %35 = vector.broadcast %cst_21 : f32 to vector<16x128xf32>
    %36 = arith.cmpf oge, %34, %35 : vector<16x128xf32>
    %cst_22 = arith.constant 1.000000e+00 : f32
    %cst_23 = arith.constant -1.000000e+00 : f32
    %37 = vector.broadcast %cst_22 : f32 to vector<16x128xf32>
    %38 = vector.broadcast %cst_23 : f32 to vector<16x128xf32>
    %39 = arith.select %36, %37, %38 : vector<16x128xi1>, vector<16x128xf32>
    %40 = math.absf %34 : vector<16x128xf32>
    %cst_24 = arith.constant 0.327591091 : f32
    %41 = vector.broadcast %cst_24 : f32 to vector<16x128xf32>
    %42 = arith.mulf %41, %40 : vector<16x128xf32>
    %cst_25 = arith.constant 1.000000e+00 : f32
    %43 = vector.broadcast %cst_25 : f32 to vector<16x128xf32>
    %44 = arith.addf %43, %42 : vector<16x128xf32>
    %cst_26 = arith.constant 1.000000e+00 : f32
    %45 = vector.broadcast %cst_26 : f32 to vector<16x128xf32>
    %46 = arith.divf %45, %44 : vector<16x128xf32>
    %cst_27 = arith.constant 1.06140542 : f32
    %47 = vector.broadcast %cst_27 : f32 to vector<16x128xf32>
    %48 = arith.mulf %46, %47 : vector<16x128xf32>
    %cst_28 = arith.constant -1.45315206 : f32
    %49 = vector.broadcast %cst_28 : f32 to vector<16x128xf32>
    %50 = arith.addf %49, %48 : vector<16x128xf32>
    %51 = arith.mulf %46, %50 : vector<16x128xf32>
    %cst_29 = arith.constant 1.42141378 : f32
    %52 = vector.broadcast %cst_29 : f32 to vector<16x128xf32>
    %53 = arith.addf %52, %51 : vector<16x128xf32>
    %54 = arith.mulf %46, %53 : vector<16x128xf32>
    %cst_30 = arith.constant -0.284496725 : f32
    %55 = vector.broadcast %cst_30 : f32 to vector<16x128xf32>
    %56 = arith.addf %55, %54 : vector<16x128xf32>
    %57 = arith.mulf %46, %56 : vector<16x128xf32>
    %cst_31 = arith.constant 0.254829586 : f32
    %58 = vector.broadcast %cst_31 : f32 to vector<16x128xf32>
    %59 = arith.addf %58, %57 : vector<16x128xf32>
    %60 = arith.mulf %46, %59 : vector<16x128xf32>
    %cst_32 = arith.constant 0.000000e+00 : f32
    %61 = vector.broadcast %cst_32 : f32 to vector<16x128xf32>
    %62 = arith.subf %61, %40 : vector<16x128xf32>
    %63 = arith.mulf %62, %40 : vector<16x128xf32>
    %64 = math.exp %63 : vector<16x128xf32>
    %65 = arith.mulf %60, %64 : vector<16x128xf32>
    %cst_33 = arith.constant 1.000000e+00 : f32
    %66 = vector.broadcast %cst_33 : f32 to vector<16x128xf32>
    %67 = arith.subf %66, %65 : vector<16x128xf32>
    %68 = arith.mulf %39, %67 : vector<16x128xf32>
    %cst_34 = arith.constant 5.000000e-01 : f32
    %69 = vector.broadcast %cst_34 : f32 to vector<16x128xf32>
    %70 = arith.mulf %69, %32 : vector<16x128xf32>
    %cst_35 = arith.constant 1.000000e+00 : f32
    %71 = vector.broadcast %cst_35 : f32 to vector<16x128xf32>
    %72 = arith.addf %71, %68 : vector<16x128xf32>
    %73 = arith.mulf %70, %72 : vector<16x128xf32>
    %74 = tpu.iota {dimensions = array<i32: 0>} : vector<16x128xi32>
    %c0_i32_36 = arith.constant 0 : i32
    %75 = vector.broadcast %c0_i32_36 : i32 to vector<16x128xi32>
    %76 = arith.cmpi eq, %74, %75 : vector<16x128xi32>
    %c1_i32_37 = arith.constant 1 : i32
    %77 = tpu.dynamic_rotate %73 by %c1_i32_37 dim 0 : vector<16x128xf32>, i32 -> vector<16x128xf32>
    %cst_38 = arith.constant 0.000000e+00 : f32
    %78 = vector.broadcast %cst_38 : f32 to vector<16x128xf32>
    %79 = arith.select %76, %78, %77 : vector<16x128xi1>, vector<16x128xf32>
    %c15_i32_39 = arith.constant 15 : i32
    %80 = vector.broadcast %c15_i32_39 : i32 to vector<16x128xi32>
    %81 = arith.cmpi eq, %74, %80 : vector<16x128xi32>
    %c15_i32_40 = arith.constant 15 : i32
    %82 = tpu.dynamic_rotate %73 by %c15_i32_40 dim 0 : vector<16x128xf32>, i32 -> vector<16x128xf32>
    %cst_41 = arith.constant 0.000000e+00 : f32
    %83 = vector.broadcast %cst_41 : f32 to vector<16x128xf32>
    %84 = arith.select %81, %83, %82 : vector<16x128xi1>, vector<16x128xf32>
    %c0_42 = arith.constant 0 : index
    %c0_43 = arith.constant 0 : index
    %c0_44 = arith.constant 0 : index
    %85 = vector.load %arg6[%c0_42, %c0_43, %c0_44] : memref<3x128x256xf32, #tpu.memory_space<vmem>>, vector<1x128x256xf32>
    %86 = vector.shape_cast %85 : vector<1x128x256xf32> to vector<128x256xf32>
    %cst_45 = arith.constant dense<0.000000e+00> : vector<16x256xf32>
    %87 = tpu.matmul %79, %86, %cst_45 {dimension_numbers = #tpu.dot_dimension_numbers<[1], [0], [0], [1], [0, 0, 1, 1], [], []>} : vector<16x128xf32>, vector<128x256xf32>, vector<16x256xf32> -> vector<16x256xf32>
    %c1_46 = arith.constant 1 : index
    %c0_47 = arith.constant 0 : index
    %c0_48 = arith.constant 0 : index
    %88 = vector.load %arg6[%c1_46, %c0_47, %c0_48] : memref<3x128x256xf32, #tpu.memory_space<vmem>>, vector<1x128x256xf32>
    %89 = vector.shape_cast %88 : vector<1x128x256xf32> to vector<128x256xf32>
    %cst_49 = arith.constant dense<0.000000e+00> : vector<16x256xf32>
    %90 = tpu.matmul %73, %89, %cst_49 {dimension_numbers = #tpu.dot_dimension_numbers<[1], [0], [0], [1], [0, 0, 1, 1], [], []>} : vector<16x128xf32>, vector<128x256xf32>, vector<16x256xf32> -> vector<16x256xf32>
    %91 = arith.addf %87, %90 : vector<16x256xf32>
    %c2_50 = arith.constant 2 : index
    %c0_51 = arith.constant 0 : index
    %c0_52 = arith.constant 0 : index
    %92 = vector.load %arg6[%c2_50, %c0_51, %c0_52] : memref<3x128x256xf32, #tpu.memory_space<vmem>>, vector<1x128x256xf32>
    %93 = vector.shape_cast %92 : vector<1x128x256xf32> to vector<128x256xf32>
    %cst_53 = arith.constant dense<0.000000e+00> : vector<16x256xf32>
    %94 = tpu.matmul %84, %93, %cst_53 {dimension_numbers = #tpu.dot_dimension_numbers<[1], [0], [0], [1], [0, 0, 1, 1], [], []>} : vector<16x128xf32>, vector<128x256xf32>, vector<16x256xf32> -> vector<16x256xf32>
    %95 = arith.addf %91, %94 : vector<16x256xf32>
    %c0_54 = arith.constant 0 : index
    %c0_55 = arith.constant 0 : index
    %96 = vector.load %arg7[%c0_54, %c0_55] : memref<1x256xf32, #tpu.memory_space<vmem>>, vector<1x256xf32>
    %97 = vector.broadcast %96 : vector<1x256xf32> to vector<16x256xf32>
    %98 = arith.addf %95, %97 : vector<16x256xf32>
    %c0_56 = arith.constant 0 : index
    %c0_57 = arith.constant 0 : index
    %99 = vector.load %arg8[%c0_56, %c0_57] : memref<1x256xf32, #tpu.memory_space<vmem>>, vector<1x256xf32>
    %100 = vector.broadcast %99 : vector<1x256xf32> to vector<16x256xf32>
    %101 = arith.mulf %98, %100 : vector<16x256xf32>
    %c0_58 = arith.constant 0 : index
    %c0_59 = arith.constant 0 : index
    %102 = vector.load %arg9[%c0_58, %c0_59] : memref<1x256xf32, #tpu.memory_space<vmem>>, vector<1x256xf32>
    %103 = vector.broadcast %102 : vector<1x256xf32> to vector<16x256xf32>
    %104 = arith.addf %101, %103 : vector<16x256xf32>
    %c0_60 = arith.constant 0 : index
    %c0_61 = arith.constant 0 : index
    %c0_62 = arith.constant 0 : index
    %105 = vector.load %arg10[%c0_60, %c0_61, %c0_62] : memref<1x16x256xf32, #tpu.memory_space<vmem>>, vector<1x16x256xf32>
    %106 = vector.shape_cast %105 : vector<1x16x256xf32> to vector<16x256xf32>
    %107 = vector.shape_cast %104 : vector<16x256xf32> to vector<1x16x256xf32>
    tpu.vector_store %arg10[%c0_60, %c0_61, %c0_62], %107 {strides = array<i32>} : memref<1x16x256xf32, #tpu.memory_space<vmem>>, vector<1x16x256xf32>,
    return
  }
  func.func @transform_0(%arg0: i32) -> (i32, i32, i32) {
    %c0_i32 = arith.constant 0 : i32
    %c0_i32_0 = arith.constant 0 : i32
    %c0_i32_1 = arith.constant 0 : i32
    return %arg0, %c0_i32, %c0_i32_0 : i32, i32, i32
  }
  func.func @transform_1(%arg0: i32) -> (i32, i32, i32) {
    %c0_i32 = arith.constant 0 : i32
    %c0_i32_0 = arith.constant 0 : i32
    %c0_i32_1 = arith.constant 0 : i32
    %c0_i32_2 = arith.constant 0 : i32
    return %c0_i32, %c0_i32_0, %c0_i32_1 : i32, i32, i32
  }
  func.func @transform_2(%arg0: i32) -> (i32, i32) {
    %c0_i32 = arith.constant 0 : i32
    %c0_i32_0 = arith.constant 0 : i32
    %c0_i32_1 = arith.constant 0 : i32
    return %c0_i32, %c0_i32_0 : i32, i32
  }
  func.func @transform_3(%arg0: i32) -> (i32, i32) {
    %c0_i32 = arith.constant 0 : i32
    %c0_i32_0 = arith.constant 0 : i32
    %c0_i32_1 = arith.constant 0 : i32
    return %c0_i32, %c0_i32_0 : i32, i32
  }
  func.func @transform_4(%arg0: i32) -> (i32, i32) {
    %c0_i32 = arith.constant 0 : i32
    %c0_i32_0 = arith.constant 0 : i32
    %c0_i32_1 = arith.constant 0 : i32
    return %c0_i32, %c0_i32_0 : i32, i32
  }
  func.func @transform_5(%arg0: i32) -> (i32, i32, i32) {
    %c0_i32 = arith.constant 0 : i32
    %c0_i32_0 = arith.constant 0 : i32
    %c0_i32_1 = arith.constant 0 : i32
    %c0_i32_2 = arith.constant 0 : i32
    return %c0_i32, %c0_i32_0, %c0_i32_1 : i32, i32, i32
  }
  func.func @transform_6(%arg0: i32) -> (i32, i32) {
    %c0_i32 = arith.constant 0 : i32
    %c0_i32_0 = arith.constant 0 : i32
    %c0_i32_1 = arith.constant 0 : i32
    return %c0_i32, %c0_i32_0 : i32, i32
  }
  func.func @transform_7(%arg0: i32) -> (i32, i32) {
    %c0_i32 = arith.constant 0 : i32
    %c0_i32_0 = arith.constant 0 : i32
    %c0_i32_1 = arith.constant 0 : i32
    return %c0_i32, %c0_i32_0 : i32, i32
  }
  func.func @transform_8(%arg0: i32) -> (i32, i32) {
    %c0_i32 = arith.constant 0 : i32
    %c0_i32_0 = arith.constant 0 : i32
    %c0_i32_1 = arith.constant 0 : i32
    return %c0_i32, %c0_i32_0 : i32, i32
  }
  func.func @transform_9(%arg0: i32) -> (i32, i32, i32) {
    %c0_i32 = arith.constant 0 : i32
    %c0_i32_0 = arith.constant 0 : i32
    %c0_i32_1 = arith.constant 0 : i32
    return %arg0, %c0_i32, %c0_i32_0 : i32, i32, i32
  }
}

module attributes {stable_mosaic.version = 11 : i64} {
  func.func @bilstm_kernel(%arg0: i32, %arg1: i32, %arg2: memref<8x2x512xf32, #tpu.memory_space<vmem>>, %arg3: memref<1x512x128xbf16, #tpu.memory_space<vmem>>, %arg4: memref<1x32x128xf32, #tpu.memory_space<vmem>>, %arg5: memref<1x1x128xf32, #tpu.memory_space<vmem>>, %arg6: memref<2x1xi32, #tpu.memory_space<vmem>>, %arg7: memref<1x8x2x32xf32, #tpu.memory_space<vmem>>, %arg8: memref<8x2x128xf32, #tpu.memory_space<vmem>>, %arg9: memref<2x32xf32, #tpu.memory_space<vmem>>, %arg10: memref<2x32xf32, #tpu.memory_space<vmem>>) attributes {dimension_semantics = [#tpu.dimension_semantics<parallel>, #tpu.dimension_semantics<arbitrary>], iteration_bounds = array<i64: 2, 1>, scalar_prefetch = 0 : i64, scratch_operands = 3 : i64, tpu.core_type = #tpu.core_type<tc>, window_params = [{transform_indices = @transform_0, window_bounds = array<i64: 8, 2, 512>}, {transform_indices = @transform_1, window_bounds = array<i64: 1, 512, 128>}, {transform_indices = @transform_2, window_bounds = array<i64: 1, 32, 128>}, {transform_indices = @transform_3, window_bounds = array<i64: 1, 1, 128>}, {pipeline_mode = #tpu.pipeline_mode<synchronous>, transform_indices = @transform_4, window_bounds = array<i64: 2, 1>}, {transform_indices = @transform_5, window_bounds = array<i64: 1, 8, 2, 32>}]} {
    %c1_i32 = arith.constant 1 : i32
    %0 = arith.subi %c1_i32, %arg0 : i32
    %1 = arith.muli %0, %arg1 : i32
    %c0_i32 = arith.constant 0 : i32
    %2 = arith.subi %c0_i32, %arg1 : i32
    %3 = arith.muli %arg0, %2 : i32
    %4 = arith.addi %1, %3 : i32
    %c0_i32_0 = arith.constant 0 : i32
    %5 = arith.cmpi eq, %arg1, %c0_i32_0 : i32
    %6 = arith.extui %5 : i1 to i32
    %c0_i32_1 = arith.constant 0 : i32
    %7 = arith.cmpi ne, %6, %c0_i32_1 : i32
    scf.if %7 {
      %cst_21 = arith.constant 0.000000e+00 : f32
      %25 = vector.broadcast %cst_21 : f32 to vector<2x32xf32>
      %c0_22 = arith.constant 0 : index
      %c0_23 = arith.constant 0 : index
      %26 = vector.load %arg9[%c0_22, %c0_23] : memref<2x32xf32, #tpu.memory_space<vmem>>, vector<2x32xf32>
      tpu.vector_store %arg9[%c0_22, %c0_23], %25 {strides = array<i32>} : memref<2x32xf32, #tpu.memory_space<vmem>>, vector<2x32xf32>,
      %cst_24 = arith.constant 0.000000e+00 : f32
      %27 = vector.broadcast %cst_24 : f32 to vector<2x32xf32>
      %c0_25 = arith.constant 0 : index
      %c0_26 = arith.constant 0 : index
      %28 = vector.load %arg10[%c0_25, %c0_26] : memref<2x32xf32, #tpu.memory_space<vmem>>, vector<2x32xf32>
      tpu.vector_store %arg10[%c0_25, %c0_26], %27 {strides = array<i32>} : memref<2x32xf32, #tpu.memory_space<vmem>>, vector<2x32xf32>,
    } else {
    }
    %c0 = arith.constant 0 : index
    %c0_2 = arith.constant 0 : index
    %c0_3 = arith.constant 0 : index
    %8 = vector.load %arg2[%c0, %c0_2, %c0_3] : memref<8x2x512xf32, #tpu.memory_space<vmem>>, vector<8x2x512xf32>
    %9 = vector.shape_cast %8 : vector<8x2x512xf32> to vector<16x512xf32>
    %10 = arith.truncf %9 : vector<16x512xf32> to vector<16x512xbf16>
    %c0_4 = arith.constant 0 : index
    %c0_5 = arith.constant 0 : index
    %c0_6 = arith.constant 0 : index
    %11 = vector.load %arg3[%c0_4, %c0_5, %c0_6] : memref<1x512x128xbf16, #tpu.memory_space<vmem>>, vector<1x512x128xbf16>
    %12 = vector.shape_cast %11 : vector<1x512x128xbf16> to vector<512x128xbf16>
    %cst = arith.constant dense<0.000000e+00> : vector<16x128xf32>
    %13 = tpu.matmul %10, %12, %cst {dimension_numbers = #tpu.dot_dimension_numbers<[1], [0], [0], [1], [0, 0, 1, 1], [], []>} : vector<16x512xbf16>, vector<512x128xbf16>, vector<16x128xf32> -> vector<16x128xf32>
    %14 = vector.shape_cast %13 : vector<16x128xf32> to vector<8x2x128xf32>
    %c0_7 = arith.constant 0 : index
    %c0_8 = arith.constant 0 : index
    %c0_9 = arith.constant 0 : index
    %15 = vector.load %arg5[%c0_7, %c0_8, %c0_9] : memref<1x1x128xf32, #tpu.memory_space<vmem>>, vector<1x1x128xf32>
    %16 = vector.shape_cast %15 : vector<1x1x128xf32> to vector<1x128xf32>
    %17 = vector.shape_cast %16 : vector<1x128xf32> to vector<1x1x128xf32>
    %18 = vector.broadcast %17 : vector<1x1x128xf32> to vector<8x2x128xf32>
    %19 = arith.addf %14, %18 : vector<8x2x128xf32>
    %c0_10 = arith.constant 0 : index
    %c0_11 = arith.constant 0 : index
    %c0_12 = arith.constant 0 : index
    %20 = vector.load %arg8[%c0_10, %c0_11, %c0_12] : memref<8x2x128xf32, #tpu.memory_space<vmem>>, vector<8x2x128xf32>
    tpu.vector_store %arg8[%c0_10, %c0_11, %c0_12], %19 {strides = array<i32>} : memref<8x2x128xf32, #tpu.memory_space<vmem>>, vector<8x2x128xf32>,
    %c0_13 = arith.constant 0 : index
    %c0_14 = arith.constant 0 : index
    %c0_15 = arith.constant 0 : index
    %21 = vector.load %arg4[%c0_13, %c0_14, %c0_15] : memref<1x32x128xf32, #tpu.memory_space<vmem>>, vector<1x32x128xf32>
    %22 = vector.shape_cast %21 : vector<1x32x128xf32> to vector<32x128xf32>
    %c0_16 = arith.constant 0 : index
    %c0_17 = arith.constant 0 : index
    %23 = vector.load %arg6[%c0_16, %c0_17] : memref<2x1xi32, #tpu.memory_space<vmem>>, vector<2x1xi32>
    %c0_i32_18 = arith.constant 0 : i32
    %c8_i32 = arith.constant 8 : i32
    %24 = arith.addi %c0_i32_18, %c8_i32 : i32
    %c1_i32_19 = arith.constant 1 : i32
    scf.for %arg11 = %c0_i32_18 to %24 step %c1_i32_19  : i32 {
      %c1_i32_21 = arith.constant 1 : i32
      %25 = arith.muli %arg11, %c1_i32_21 : i32
      %c0_i32_22 = arith.constant 0 : i32
      %26 = arith.addi %c0_i32_22, %25 : i32
      %c1_i32_23 = arith.constant 1 : i32
      %27 = arith.subi %c1_i32_23, %arg0 : i32
      %28 = arith.muli %27, %26 : i32
      %c7_i32 = arith.constant 7 : i32
      %29 = arith.subi %c7_i32, %26 : i32
      %30 = arith.muli %arg0, %29 : i32
      %31 = arith.addi %28, %30 : i32
      %c8_i32_24 = arith.constant 8 : i32
      %32 = arith.muli %4, %c8_i32_24 : i32
      %33 = arith.addi %32, %31 : i32
      %34 = vector.broadcast %33 : i32 to vector<2x1xi32>
      %35 = arith.cmpi slt, %34, %23 : vector<2x1xi32>
      %36 = arith.index_cast %31 : i32 to index
      %c0_25 = arith.constant 0 : index
      %c0_26 = arith.constant 0 : index
      %37 = vector.load %arg8[%36, %c0_25, %c0_26] : memref<8x2x128xf32, #tpu.memory_space<vmem>>, vector<1x2x128xf32>
      %38 = vector.shape_cast %37 : vector<1x2x128xf32> to vector<2x128xf32>
      %c0_27 = arith.constant 0 : index
      %c0_28 = arith.constant 0 : index
      %39 = vector.load %arg9[%c0_27, %c0_28] : memref<2x32xf32, #tpu.memory_space<vmem>>, vector<2x32xf32>
      %c0_29 = arith.constant 0 : index
      %c0_30 = arith.constant 0 : index
      %40 = vector.load %arg10[%c0_29, %c0_30] : memref<2x32xf32, #tpu.memory_space<vmem>>, vector<2x32xf32>
      %cst_31 = arith.constant dense<0.000000e+00> : vector<2x128xf32>
      %41 = tpu.matmul %39, %22, %cst_31 {dimension_numbers = #tpu.dot_dimension_numbers<[1], [0], [0], [1], [0, 0, 1, 1], [], []>} : vector<2x32xf32>, vector<32x128xf32>, vector<2x128xf32> -> vector<2x128xf32>
      %42 = arith.addf %38, %41 : vector<2x128xf32>
      %43 = vector.extract_strided_slice %42 {offsets = [0, 0], sizes = [2, 32], strides = [1, 1]} : vector<2x128xf32> to vector<2x32xf32>
      %44 = arith.negf %43 : vector<2x32xf32>
      %45 = math.exp %44 : vector<2x32xf32>
      %cst_32 = arith.constant 1.000000e+00 : f32
      %46 = vector.broadcast %cst_32 : f32 to vector<2x32xf32>
      %47 = arith.addf %46, %45 : vector<2x32xf32>
      %48 = arith.divf %46, %47 : vector<2x32xf32>
      %49 = vector.extract_strided_slice %42 {offsets = [0, 32], sizes = [2, 32], strides = [1, 1]} : vector<2x128xf32> to vector<2x32xf32>
      %50 = arith.negf %49 : vector<2x32xf32>
      %51 = math.exp %50 : vector<2x32xf32>
      %cst_33 = arith.constant 1.000000e+00 : f32
      %52 = vector.broadcast %cst_33 : f32 to vector<2x32xf32>
      %53 = arith.addf %52, %51 : vector<2x32xf32>
      %54 = arith.divf %52, %53 : vector<2x32xf32>
      %55 = vector.extract_strided_slice %42 {offsets = [0, 64], sizes = [2, 32], strides = [1, 1]} : vector<2x128xf32> to vector<2x32xf32>
      %56 = math.tanh %55 : vector<2x32xf32>
      %57 = vector.extract_strided_slice %42 {offsets = [0, 96], sizes = [2, 32], strides = [1, 1]} : vector<2x128xf32> to vector<2x32xf32>
      %58 = arith.negf %57 : vector<2x32xf32>
      %59 = math.exp %58 : vector<2x32xf32>
      %cst_34 = arith.constant 1.000000e+00 : f32
      %60 = vector.broadcast %cst_34 : f32 to vector<2x32xf32>
      %61 = arith.addf %60, %59 : vector<2x32xf32>
      %62 = arith.divf %60, %61 : vector<2x32xf32>
      %63 = arith.mulf %54, %40 : vector<2x32xf32>
      %64 = arith.mulf %48, %56 : vector<2x32xf32>
      %65 = arith.addf %63, %64 : vector<2x32xf32>
      %66 = math.tanh %65 : vector<2x32xf32>
      %67 = arith.mulf %62, %66 : vector<2x32xf32>
      %68 = vector.shape_cast %35 : vector<2x1xi1> to vector<2x1xi1>
      %69 = vector.broadcast %68 : vector<2x1xi1> to vector<2x32xi1>
      %70 = arith.select %69, %67, %39 : vector<2x32xi1>, vector<2x32xf32>
      %c0_35 = arith.constant 0 : index
      %c0_36 = arith.constant 0 : index
      %71 = vector.load %arg9[%c0_35, %c0_36] : memref<2x32xf32, #tpu.memory_space<vmem>>, vector<2x32xf32>
      tpu.vector_store %arg9[%c0_35, %c0_36], %70 {strides = array<i32>} : memref<2x32xf32, #tpu.memory_space<vmem>>, vector<2x32xf32>,
      %72 = vector.shape_cast %35 : vector<2x1xi1> to vector<2x1xi1>
      %73 = vector.broadcast %72 : vector<2x1xi1> to vector<2x32xi1>
      %74 = arith.select %73, %65, %40 : vector<2x32xi1>, vector<2x32xf32>
      %c0_37 = arith.constant 0 : index
      %c0_38 = arith.constant 0 : index
      %75 = vector.load %arg10[%c0_37, %c0_38] : memref<2x32xf32, #tpu.memory_space<vmem>>, vector<2x32xf32>
      tpu.vector_store %arg10[%c0_37, %c0_38], %74 {strides = array<i32>} : memref<2x32xf32, #tpu.memory_space<vmem>>, vector<2x32xf32>,
      %cst_39 = arith.constant 0.000000e+00 : f32
      %76 = vector.shape_cast %35 : vector<2x1xi1> to vector<2x1xi1>
      %77 = vector.broadcast %76 : vector<2x1xi1> to vector<2x32xi1>
      %78 = vector.broadcast %cst_39 : f32 to vector<2x32xf32>
      %79 = arith.select %77, %67, %78 : vector<2x32xi1>, vector<2x32xf32>
      %c0_40 = arith.constant 0 : index
      %80 = arith.index_cast %31 : i32 to index
      %c0_41 = arith.constant 0 : index
      %c0_42 = arith.constant 0 : index
      %81 = vector.load %arg7[%c0_40, %80, %c0_41, %c0_42] : memref<1x8x2x32xf32, #tpu.memory_space<vmem>>, vector<1x1x2x32xf32>
      %82 = vector.shape_cast %81 : vector<1x1x2x32xf32> to vector<2x32xf32>
      %83 = vector.shape_cast %79 : vector<2x32xf32> to vector<1x1x2x32xf32>
      tpu.vector_store %arg7[%c0_40, %80, %c0_41, %c0_42], %83 {strides = array<i32>} : memref<1x8x2x32xf32, #tpu.memory_space<vmem>>, vector<1x1x2x32xf32>,
    }
    %c8_i32_20 = arith.constant 8 : i32
    return
  }
  func.func @transform_0(%arg0: i32, %arg1: i32) -> (i32, i32, i32) {
    %c1_i32 = arith.constant 1 : i32
    %0 = arith.subi %c1_i32, %arg0 : i32
    %1 = arith.muli %0, %arg1 : i32
    %c0_i32 = arith.constant 0 : i32
    %2 = arith.subi %c0_i32, %arg1 : i32
    %3 = arith.muli %arg0, %2 : i32
    %4 = arith.addi %1, %3 : i32
    %c0_i32_0 = arith.constant 0 : i32
    %c0_i32_1 = arith.constant 0 : i32
    %c0_i32_2 = arith.constant 0 : i32
    return %4, %c0_i32_0, %c0_i32_1 : i32, i32, i32
  }
  func.func @transform_1(%arg0: i32, %arg1: i32) -> (i32, i32, i32) {
    %c0_i32 = arith.constant 0 : i32
    %c0_i32_0 = arith.constant 0 : i32
    %c0_i32_1 = arith.constant 0 : i32
    return %arg0, %c0_i32, %c0_i32_0 : i32, i32, i32
  }
  func.func @transform_2(%arg0: i32, %arg1: i32) -> (i32, i32, i32) {
    %c0_i32 = arith.constant 0 : i32
    %c0_i32_0 = arith.constant 0 : i32
    %c0_i32_1 = arith.constant 0 : i32
    return %arg0, %c0_i32, %c0_i32_0 : i32, i32, i32
  }
  func.func @transform_3(%arg0: i32, %arg1: i32) -> (i32, i32, i32) {
    %c0_i32 = arith.constant 0 : i32
    %c0_i32_0 = arith.constant 0 : i32
    %c0_i32_1 = arith.constant 0 : i32
    return %arg0, %c0_i32, %c0_i32_0 : i32, i32, i32
  }
  func.func @transform_4(%arg0: i32, %arg1: i32) -> (i32, i32) {
    %c0_i32 = arith.constant 0 : i32
    %c0_i32_0 = arith.constant 0 : i32
    %c0_i32_1 = arith.constant 0 : i32
    return %c0_i32, %c0_i32_0 : i32, i32
  }
  func.func @transform_5(%arg0: i32, %arg1: i32) -> (i32, i32, i32, i32) {
    %c1_i32 = arith.constant 1 : i32
    %0 = arith.subi %c1_i32, %arg0 : i32
    %1 = arith.muli %0, %arg1 : i32
    %c0_i32 = arith.constant 0 : i32
    %2 = arith.subi %c0_i32, %arg1 : i32
    %3 = arith.muli %arg0, %2 : i32
    %4 = arith.addi %1, %3 : i32
    %c0_i32_0 = arith.constant 0 : i32
    %c0_i32_1 = arith.constant 0 : i32
    %c0_i32_2 = arith.constant 0 : i32
    return %arg0, %4, %c0_i32_0, %c0_i32_1 : i32, i32, i32, i32
  }
}

module attributes {stable_mosaic.version = 11 : i64} {
  func.func @bilstm_kernel(%arg0: i32, %arg1: i32, %arg2: memref<4x2x128xf32, #tpu.memory_space<vmem>>, %arg3: memref<1x128x128xbf16, #tpu.memory_space<vmem>>, %arg4: memref<1x32x128xf32, #tpu.memory_space<vmem>>, %arg5: memref<1x1x128xf32, #tpu.memory_space<vmem>>, %arg6: memref<2x1xi32, #tpu.memory_space<vmem>>, %arg7: memref<1x4x2x32xf32, #tpu.memory_space<vmem>>, %arg8: memref<4x2x128xf32, #tpu.memory_space<vmem>>, %arg9: memref<2x32xf32, #tpu.memory_space<vmem>>, %arg10: memref<2x32xf32, #tpu.memory_space<vmem>>) attributes {dimension_semantics = [#tpu.dimension_semantics<parallel>, #tpu.dimension_semantics<arbitrary>], iteration_bounds = array<i64: 2, 1>, scalar_prefetch = 0 : i64, scratch_operands = 3 : i64, tpu.core_type = #tpu.core_type<tc>, window_params = [{transform_indices = @transform_0, window_bounds = array<i64: 4, 2, 128>}, {transform_indices = @transform_1, window_bounds = array<i64: 1, 128, 128>}, {transform_indices = @transform_2, window_bounds = array<i64: 1, 32, 128>}, {transform_indices = @transform_3, window_bounds = array<i64: 1, 1, 128>}, {pipeline_mode = #tpu.pipeline_mode<synchronous>, transform_indices = @transform_4, window_bounds = array<i64: 2, 1>}, {transform_indices = @transform_5, window_bounds = array<i64: 1, 4, 2, 32>}]} {
    %c1_i32 = arith.constant 1 : i32
    %0 = arith.subi %c1_i32, %arg0 : i32
    %1 = arith.muli %0, %arg1 : i32
    %c0_i32 = arith.constant 0 : i32
    %2 = arith.subi %c0_i32, %arg1 : i32
    %3 = arith.muli %arg0, %2 : i32
    %4 = arith.addi %1, %3 : i32
    %c0_i32_0 = arith.constant 0 : i32
    %5 = arith.cmpi eq, %arg1, %c0_i32_0 : i32
    %6 = arith.extui %5 : i1 to i32
    %c0_i32_1 = arith.constant 0 : i32
    %7 = arith.cmpi ne, %6, %c0_i32_1 : i32
    scf.if %7 {
      %cst_21 = arith.constant 0.000000e+00 : f32
      %25 = vector.broadcast %cst_21 : f32 to vector<2x32xf32>
      %c0_22 = arith.constant 0 : index
      %c0_23 = arith.constant 0 : index
      %26 = vector.load %arg9[%c0_22, %c0_23] : memref<2x32xf32, #tpu.memory_space<vmem>>, vector<2x32xf32>
      tpu.vector_store %arg9[%c0_22, %c0_23], %25 {strides = array<i32>} : memref<2x32xf32, #tpu.memory_space<vmem>>, vector<2x32xf32>,
      %cst_24 = arith.constant 0.000000e+00 : f32
      %27 = vector.broadcast %cst_24 : f32 to vector<2x32xf32>
      %c0_25 = arith.constant 0 : index
      %c0_26 = arith.constant 0 : index
      %28 = vector.load %arg10[%c0_25, %c0_26] : memref<2x32xf32, #tpu.memory_space<vmem>>, vector<2x32xf32>
      tpu.vector_store %arg10[%c0_25, %c0_26], %27 {strides = array<i32>} : memref<2x32xf32, #tpu.memory_space<vmem>>, vector<2x32xf32>,
    } else {
    }
    %c0 = arith.constant 0 : index
    %c0_2 = arith.constant 0 : index
    %c0_3 = arith.constant 0 : index
    %8 = vector.load %arg2[%c0, %c0_2, %c0_3] : memref<4x2x128xf32, #tpu.memory_space<vmem>>, vector<4x2x128xf32>
    %9 = vector.shape_cast %8 : vector<4x2x128xf32> to vector<8x128xf32>
    %10 = arith.truncf %9 : vector<8x128xf32> to vector<8x128xbf16>
    %c0_4 = arith.constant 0 : index
    %c0_5 = arith.constant 0 : index
    %c0_6 = arith.constant 0 : index
    %11 = vector.load %arg3[%c0_4, %c0_5, %c0_6] : memref<1x128x128xbf16, #tpu.memory_space<vmem>>, vector<1x128x128xbf16>
    %12 = vector.shape_cast %11 : vector<1x128x128xbf16> to vector<128x128xbf16>
    %cst = arith.constant dense<0.000000e+00> : vector<8x128xf32>
    %13 = tpu.matmul %10, %12, %cst {dimension_numbers = #tpu.dot_dimension_numbers<[1], [0], [0], [1], [0, 0, 1, 1], [], []>} : vector<8x128xbf16>, vector<128x128xbf16>, vector<8x128xf32> -> vector<8x128xf32>
    %14 = vector.shape_cast %13 : vector<8x128xf32> to vector<4x2x128xf32>
    %c0_7 = arith.constant 0 : index
    %c0_8 = arith.constant 0 : index
    %c0_9 = arith.constant 0 : index
    %15 = vector.load %arg5[%c0_7, %c0_8, %c0_9] : memref<1x1x128xf32, #tpu.memory_space<vmem>>, vector<1x1x128xf32>
    %16 = vector.shape_cast %15 : vector<1x1x128xf32> to vector<1x128xf32>
    %17 = vector.shape_cast %16 : vector<1x128xf32> to vector<1x1x128xf32>
    %18 = vector.broadcast %17 : vector<1x1x128xf32> to vector<4x2x128xf32>
    %19 = arith.addf %14, %18 : vector<4x2x128xf32>
    %c0_10 = arith.constant 0 : index
    %c0_11 = arith.constant 0 : index
    %c0_12 = arith.constant 0 : index
    %20 = vector.load %arg8[%c0_10, %c0_11, %c0_12] : memref<4x2x128xf32, #tpu.memory_space<vmem>>, vector<4x2x128xf32>
    tpu.vector_store %arg8[%c0_10, %c0_11, %c0_12], %19 {strides = array<i32>} : memref<4x2x128xf32, #tpu.memory_space<vmem>>, vector<4x2x128xf32>,
    %c0_13 = arith.constant 0 : index
    %c0_14 = arith.constant 0 : index
    %c0_15 = arith.constant 0 : index
    %21 = vector.load %arg4[%c0_13, %c0_14, %c0_15] : memref<1x32x128xf32, #tpu.memory_space<vmem>>, vector<1x32x128xf32>
    %22 = vector.shape_cast %21 : vector<1x32x128xf32> to vector<32x128xf32>
    %c0_16 = arith.constant 0 : index
    %c0_17 = arith.constant 0 : index
    %23 = vector.load %arg6[%c0_16, %c0_17] : memref<2x1xi32, #tpu.memory_space<vmem>>, vector<2x1xi32>
    %c0_i32_18 = arith.constant 0 : i32
    %c4_i32 = arith.constant 4 : i32
    %24 = arith.addi %c0_i32_18, %c4_i32 : i32
    %c1_i32_19 = arith.constant 1 : i32
    scf.for %arg11 = %c0_i32_18 to %24 step %c1_i32_19  : i32 {
      %c1_i32_21 = arith.constant 1 : i32
      %25 = arith.muli %arg11, %c1_i32_21 : i32
      %c0_i32_22 = arith.constant 0 : i32
      %26 = arith.addi %c0_i32_22, %25 : i32
      %c1_i32_23 = arith.constant 1 : i32
      %27 = arith.subi %c1_i32_23, %arg0 : i32
      %28 = arith.muli %27, %26 : i32
      %c3_i32 = arith.constant 3 : i32
      %29 = arith.subi %c3_i32, %26 : i32
      %30 = arith.muli %arg0, %29 : i32
      %31 = arith.addi %28, %30 : i32
      %c4_i32_24 = arith.constant 4 : i32
      %32 = arith.muli %4, %c4_i32_24 : i32
      %33 = arith.addi %32, %31 : i32
      %34 = vector.broadcast %33 : i32 to vector<2x1xi32>
      %35 = arith.cmpi slt, %34, %23 : vector<2x1xi32>
      %36 = arith.index_cast %31 : i32 to index
      %c0_25 = arith.constant 0 : index
      %c0_26 = arith.constant 0 : index
      %37 = vector.load %arg8[%36, %c0_25, %c0_26] : memref<4x2x128xf32, #tpu.memory_space<vmem>>, vector<1x2x128xf32>
      %38 = vector.shape_cast %37 : vector<1x2x128xf32> to vector<2x128xf32>
      %c0_27 = arith.constant 0 : index
      %c0_28 = arith.constant 0 : index
      %39 = vector.load %arg9[%c0_27, %c0_28] : memref<2x32xf32, #tpu.memory_space<vmem>>, vector<2x32xf32>
      %c0_29 = arith.constant 0 : index
      %c0_30 = arith.constant 0 : index
      %40 = vector.load %arg10[%c0_29, %c0_30] : memref<2x32xf32, #tpu.memory_space<vmem>>, vector<2x32xf32>
      %cst_31 = arith.constant dense<0.000000e+00> : vector<2x128xf32>
      %41 = tpu.matmul %39, %22, %cst_31 {dimension_numbers = #tpu.dot_dimension_numbers<[1], [0], [0], [1], [0, 0, 1, 1], [], []>} : vector<2x32xf32>, vector<32x128xf32>, vector<2x128xf32> -> vector<2x128xf32>
      %42 = arith.addf %38, %41 : vector<2x128xf32>
      %43 = vector.extract_strided_slice %42 {offsets = [0, 0], sizes = [2, 32], strides = [1, 1]} : vector<2x128xf32> to vector<2x32xf32>
      %44 = arith.negf %43 : vector<2x32xf32>
      %45 = math.exp %44 : vector<2x32xf32>
      %cst_32 = arith.constant 1.000000e+00 : f32
      %46 = vector.broadcast %cst_32 : f32 to vector<2x32xf32>
      %47 = arith.addf %46, %45 : vector<2x32xf32>
      %48 = arith.divf %46, %47 : vector<2x32xf32>
      %49 = vector.extract_strided_slice %42 {offsets = [0, 32], sizes = [2, 32], strides = [1, 1]} : vector<2x128xf32> to vector<2x32xf32>
      %50 = arith.negf %49 : vector<2x32xf32>
      %51 = math.exp %50 : vector<2x32xf32>
      %cst_33 = arith.constant 1.000000e+00 : f32
      %52 = vector.broadcast %cst_33 : f32 to vector<2x32xf32>
      %53 = arith.addf %52, %51 : vector<2x32xf32>
      %54 = arith.divf %52, %53 : vector<2x32xf32>
      %55 = vector.extract_strided_slice %42 {offsets = [0, 64], sizes = [2, 32], strides = [1, 1]} : vector<2x128xf32> to vector<2x32xf32>
      %56 = math.tanh %55 : vector<2x32xf32>
      %57 = vector.extract_strided_slice %42 {offsets = [0, 96], sizes = [2, 32], strides = [1, 1]} : vector<2x128xf32> to vector<2x32xf32>
      %58 = arith.negf %57 : vector<2x32xf32>
      %59 = math.exp %58 : vector<2x32xf32>
      %cst_34 = arith.constant 1.000000e+00 : f32
      %60 = vector.broadcast %cst_34 : f32 to vector<2x32xf32>
      %61 = arith.addf %60, %59 : vector<2x32xf32>
      %62 = arith.divf %60, %61 : vector<2x32xf32>
      %63 = arith.mulf %54, %40 : vector<2x32xf32>
      %64 = arith.mulf %48, %56 : vector<2x32xf32>
      %65 = arith.addf %63, %64 : vector<2x32xf32>
      %66 = math.tanh %65 : vector<2x32xf32>
      %67 = arith.mulf %62, %66 : vector<2x32xf32>
      %68 = vector.shape_cast %35 : vector<2x1xi1> to vector<2x1xi1>
      %69 = vector.broadcast %68 : vector<2x1xi1> to vector<2x32xi1>
      %70 = arith.select %69, %67, %39 : vector<2x32xi1>, vector<2x32xf32>
      %c0_35 = arith.constant 0 : index
      %c0_36 = arith.constant 0 : index
      %71 = vector.load %arg9[%c0_35, %c0_36] : memref<2x32xf32, #tpu.memory_space<vmem>>, vector<2x32xf32>
      tpu.vector_store %arg9[%c0_35, %c0_36], %70 {strides = array<i32>} : memref<2x32xf32, #tpu.memory_space<vmem>>, vector<2x32xf32>,
      %72 = vector.shape_cast %35 : vector<2x1xi1> to vector<2x1xi1>
      %73 = vector.broadcast %72 : vector<2x1xi1> to vector<2x32xi1>
      %74 = arith.select %73, %65, %40 : vector<2x32xi1>, vector<2x32xf32>
      %c0_37 = arith.constant 0 : index
      %c0_38 = arith.constant 0 : index
      %75 = vector.load %arg10[%c0_37, %c0_38] : memref<2x32xf32, #tpu.memory_space<vmem>>, vector<2x32xf32>
      tpu.vector_store %arg10[%c0_37, %c0_38], %74 {strides = array<i32>} : memref<2x32xf32, #tpu.memory_space<vmem>>, vector<2x32xf32>,
      %cst_39 = arith.constant 0.000000e+00 : f32
      %76 = vector.shape_cast %35 : vector<2x1xi1> to vector<2x1xi1>
      %77 = vector.broadcast %76 : vector<2x1xi1> to vector<2x32xi1>
      %78 = vector.broadcast %cst_39 : f32 to vector<2x32xf32>
      %79 = arith.select %77, %67, %78 : vector<2x32xi1>, vector<2x32xf32>
      %c0_40 = arith.constant 0 : index
      %80 = arith.index_cast %31 : i32 to index
      %c0_41 = arith.constant 0 : index
      %c0_42 = arith.constant 0 : index
      %81 = vector.load %arg7[%c0_40, %80, %c0_41, %c0_42] : memref<1x4x2x32xf32, #tpu.memory_space<vmem>>, vector<1x1x2x32xf32>
      %82 = vector.shape_cast %81 : vector<1x1x2x32xf32> to vector<2x32xf32>
      %83 = vector.shape_cast %79 : vector<2x32xf32> to vector<1x1x2x32xf32>
      tpu.vector_store %arg7[%c0_40, %80, %c0_41, %c0_42], %83 {strides = array<i32>} : memref<1x4x2x32xf32, #tpu.memory_space<vmem>>, vector<1x1x2x32xf32>,
    }
    %c4_i32_20 = arith.constant 4 : i32
    return
  }
  func.func @transform_0(%arg0: i32, %arg1: i32) -> (i32, i32, i32) {
    %c1_i32 = arith.constant 1 : i32
    %0 = arith.subi %c1_i32, %arg0 : i32
    %1 = arith.muli %0, %arg1 : i32
    %c0_i32 = arith.constant 0 : i32
    %2 = arith.subi %c0_i32, %arg1 : i32
    %3 = arith.muli %arg0, %2 : i32
    %4 = arith.addi %1, %3 : i32
    %c0_i32_0 = arith.constant 0 : i32
    %c0_i32_1 = arith.constant 0 : i32
    %c0_i32_2 = arith.constant 0 : i32
    return %4, %c0_i32_0, %c0_i32_1 : i32, i32, i32
  }
  func.func @transform_1(%arg0: i32, %arg1: i32) -> (i32, i32, i32) {
    %c0_i32 = arith.constant 0 : i32
    %c0_i32_0 = arith.constant 0 : i32
    %c0_i32_1 = arith.constant 0 : i32
    return %arg0, %c0_i32, %c0_i32_0 : i32, i32, i32
  }
  func.func @transform_2(%arg0: i32, %arg1: i32) -> (i32, i32, i32) {
    %c0_i32 = arith.constant 0 : i32
    %c0_i32_0 = arith.constant 0 : i32
    %c0_i32_1 = arith.constant 0 : i32
    return %arg0, %c0_i32, %c0_i32_0 : i32, i32, i32
  }
  func.func @transform_3(%arg0: i32, %arg1: i32) -> (i32, i32, i32) {
    %c0_i32 = arith.constant 0 : i32
    %c0_i32_0 = arith.constant 0 : i32
    %c0_i32_1 = arith.constant 0 : i32
    return %arg0, %c0_i32, %c0_i32_0 : i32, i32, i32
  }
  func.func @transform_4(%arg0: i32, %arg1: i32) -> (i32, i32) {
    %c0_i32 = arith.constant 0 : i32
    %c0_i32_0 = arith.constant 0 : i32
    %c0_i32_1 = arith.constant 0 : i32
    return %c0_i32, %c0_i32_0 : i32, i32
  }
  func.func @transform_5(%arg0: i32, %arg1: i32) -> (i32, i32, i32, i32) {
    %c1_i32 = arith.constant 1 : i32
    %0 = arith.subi %c1_i32, %arg0 : i32
    %1 = arith.muli %0, %arg1 : i32
    %c0_i32 = arith.constant 0 : i32
    %2 = arith.subi %c0_i32, %arg1 : i32
    %3 = arith.muli %arg0, %2 : i32
    %4 = arith.addi %1, %3 : i32
    %c0_i32_0 = arith.constant 0 : i32
    %c0_i32_1 = arith.constant 0 : i32
    %c0_i32_2 = arith.constant 0 : i32
    return %arg0, %4, %c0_i32_0, %c0_i32_1 : i32, i32, i32, i32
  }
}

</mosaic_0001>

<bundles_post_ra>
// kernel: encoder_forward.3
= control target key start
LH: loop header
LB: loop body
LE: loop exit
PB: predicated region body
PF: predicated region fallthrough
CT: control target
= control target key end

     0   :  { %14 = vsyncpa [#allocation3], 0  ;;  %s2090_s0 = inlined_call_operand.hbm [shape: f32[2,16,16], index: 0, kind: input, shape index: {}]   ;;  %s2091_s1 = inlined_call_operand.vmem [shape: f32[3,16,128], index: 1, kind: input, shape index: {}]   ;;  %s2092_s2 = inlined_call_operand.vmem [shape: f32[1,128], index: 2, kind: input, shape index: {}]   ;;  %s2093_s3 = inlined_call_operand.hbm [shape: f32[1,128], index: 3, kind: input, shape index: {}]   ;;  %s2094_s4 = inlined_call_operand.hbm [shape: f32[1,128], index: 4, kind: input, shape index: {}]   ;;  %s2095_s5 = inlined_call_operand.hbm [shape: f32[3,128,256], index: 5, kind: input, shape index: {}]   ;;  %s2096_s6 = inlined_call_operand.vmem [shape: f32[1,256], index: 6, kind: input, shape index: {}]   ;;  %s2097_s7 = inlined_call_operand.vmem [shape: f32[1,256], index: 7, kind: input, shape index: {}]   ;;  %s2098_s8 = inlined_call_operand.hbm [shape: f32[1,256], index: 8, kind: input, shape index: {}]   ;;  %s2099_s9 = inlined_call_operand.vmem [shape: f32[2,16,256], index: 9, kind: output, shape index: {}]  }
   0x1   :  { %16 = vsyncpa [#allocation3 + $0x1], 0 }
   0x2   :  { %17 = vsyncpa [#allocation5], 0 }
   0x3   :  { %18 = vsyncpa [#allocation8], 0  ;;  %s1798_s30 = smov 0   ;;  %s1800_s10 = smov 0  }
   0x4   :  { %s1802_s11 = smov 0   ;;  %s1804_s12 = smov 0  }
   0x5 LB: > { %s1817_s13 = sadd.s32 4294967295, %s1735_s12   ;;  %p44_p0 = scmp.ne.s32.totalorder %s1727_s10, %s1723_s30  ;;  %s1735_s12 = sphi %s1804_s12, %s2117_s12   ;;  %s1731_s11 = sphi %s1802_s11, %s2116_s11   ;;  %s1727_s10 = sphi %s1800_s10, %s2115_s10   ;;  %s1723_s30 = sphi %s1798_s30, %s2114_s30  }
   0x6   : > { %p2100_p1 = scmp.eq.s32.totalorder %s1817_s13, 0  ;;  %p1266_p2 = scmp.ge.s32.totalorder %s1735_s12, 1 }
   0x7   : > { %p249_p3 = scmp.lt.s32.totalorder %s1735_s12, 3  ;;  %s1737_s16 = smov [#allocation4]  }
   0x8   : > { %p1825_p4 = por %p2100_p1, %p44_p0  ;;  %s268_s17 = sshll.u32 %s1737_s16, 4  ;;  %s269_s17 = int_to_ptr.vmem [resolvable:$true] %s268_s17 }
   0x9   : > { %p1829_p5 = pnand %p1266_p2, %p249_p3  ;;  %s1738_s18 = smov [#allocation7]  }
   0xa   : > { %s2103_s14 = scalar_select %p1825_p4, 1, 0 }
   0xb   : > { %s2104_s15 = scalar_select %p1829_p5, 1, 0 }
   0xc   : > { %p1475_p6 = pneg %p1829_p5  ;;  %s289_s19 = sshll.u32 %s1738_s18, 4  ;;  %s1841_s19 = int_to_ptr.vmem [resolvable:$true] %s289_s19 }
   0xd   : > { %s1739_s21 = smov [#allocation6]   ;;  %s1551_s25 = scalar_lea.hbm %s2093_s3, 16 }
   0xe   : > { %p1837_p7 = pnand %p1475_p6, %p2100_p1  ;;  %s1843_s22 = sshll.u32 %s1739_s21, 4  ;;  %s280_s22 = int_to_ptr.vmem [resolvable:$true] %s1843_s22 }
   0xf   : > { %p1552_p8 = scmp.ne.s32.totalorder %s2093_s3, %s1551_s25  ;;  %p1558_p12 = scmp.lt.u32.totalorder %s1551_s25, %s2093_s3 }
  0x10   : > { %p1853_p9 = pneg %p1837_p7 }
  0x12   : > { %p1554_p10 = pnand %p1853_p9, %p1552_p8 }
  0x14   : > { %p1555_p11 = pneg %p1554_p10 }
  0x16   : > { %p1560_p13 = pnand %p1558_p12, %p1555_p11 }
  0x18   : > { %1563 = shalt.err (!%p1560_p13)
}
  0x19   : > { %s1564_s16 = scalar_lea.vmem %s269_s17, 16  ;;  %s1571_s18 = scalar_lea.vmem %s269_s17, 32 }
  0x1a   : > { %p1565_p0 = scmp.ne.s32.totalorder %s269_s17, %s1564_s16  ;;  %p1572_p6 = scmp.lt.s32.totalorder %s269_s17, %s269_s17 }
  0x1b   : > { %p1573_p1 = scmp.lt.s32.totalorder %s1571_s18, %s1564_s16 }
  0x1c   : > { %p1567_p2 = pnand %p1565_p0, %p1853_p9 }
  0x1d   : > { %p1574_p4 = por %p1573_p1, %p1572_p6 }
  0x1e   : > { %p1568_p3 = pneg %p1567_p2 }
  0x20   : > { %p1575_p5 = pnand %p1574_p4, %p1568_p3 }
  0x22   : > { %1578 = shalt.err (!%p1575_p5)
}
  0x23   : > { %1478 = dma.hbm_to_vmem [thread:$0]  (!%p1837_p7), %s2093_s3, 16, %s269_s17, [#allocation5]  }
  0x24   : > { %s1579_s26 = scalar_lea.hbm %s2095_s5, 12288 }
  0x25   : > { %p1580_p8 = scmp.ne.s32.totalorder %s2095_s5, %s1579_s26  ;;  %p1586_p4 = scmp.lt.u32.totalorder %s1579_s26, %s2095_s5 }
  0x27   : > { %p1582_p10 = pnand %p1580_p8, %p1853_p9 }
  0x29   : > { %p1583_p1 = pneg %p1582_p10 }
  0x2b   : > { %p1588_p5 = pnand %p1586_p4, %p1583_p1 }
  0x2d   : > { %1591 = shalt.err (!%p1588_p5)
}
  0x2e   : > { %s1592_s17 = scalar_lea.vmem %s1841_s19, 12288  ;;  %p1600_p0 = scmp.lt.s32.totalorder %s1841_s19, %s1841_s19 }
  0x2f   : > { %p1593_p11 = scmp.ne.s32.totalorder %s1841_s19, %s1592_s17  ;;  %p1601_p2 = scmp.lt.s32.totalorder %s1592_s17, %s1592_s17 }
  0x31   : > { %p1595_p12 = pnand %p1593_p11, %p1853_p9  ;;  %p1602_p3 = por %p1601_p2, %p1600_p0 }
  0x33   : > { %p1596_p13 = pneg %p1595_p12 }
  0x35   : > { %p1603_p6 = pnand %p1602_p3, %p1596_p13 }
  0x37   : > { %1606 = shalt.err (!%p1603_p6)
}
  0x38   : > { %s1740_s18 = smov 256   ;;  %s1741_s21 = smov 16  }
  0x39   : > { %1484 = dma.hbm_to_vmem [thread:$0]  (!%p1837_p7), %s2095_s5, 12288, %s1841_s19, [#allocation8], %s1740_s18, %s1740_s18, %s1741_s21  }
  0x3a   : > { %s1607_s27 = scalar_lea.hbm %s2094_s4, 16 }
  0x3b   : > { %p1608_p8 = scmp.ne.s32.totalorder %s2094_s4, %s1607_s27  ;;  %p1614_p4 = scmp.lt.u32.totalorder %s1607_s27, %s2094_s4 }
  0x3d   : > { %p1610_p10 = pnand %p1608_p8, %p1853_p9 }
  0x3f   : > { %p1611_p1 = pneg %p1610_p10 }
  0x41   : > { %p1616_p5 = pnand %p1614_p4, %p1611_p1 }
  0x43   : > { %1619 = shalt.err (!%p1616_p5)
}
  0x44   : > { %s1620_s23 = scalar_lea.vmem %s280_s22, 16  ;;  %s1627_s19 = scalar_lea.vmem %s280_s22, 32 }
  0x45   : > { %p1621_p11 = scmp.ne.s32.totalorder %s280_s22, %s1620_s23  ;;  %p1628_p0 = scmp.lt.s32.totalorder %s280_s22, %s280_s22 }
  0x46   : > { %p1629_p2 = scmp.lt.s32.totalorder %s1627_s19, %s1620_s23 }
  0x47   : > { %p1623_p12 = pnand %p1621_p11, %p1853_p9 }
  0x48   : > { %p1630_p3 = por %p1629_p2, %p1628_p0 }
  0x49   : > { %p1624_p13 = pneg %p1623_p12 }
  0x4b   : > { %p1631_p6 = pnand %p1630_p3, %p1624_p13 }
  0x4d   : > { %1634 = shalt.err (!%p1631_p6)
}
  0x4e   : > { %1481 = dma.hbm_to_vmem [thread:$0]  (!%p1837_p7), %s2094_s4, 16, %s280_s22, [#allocation5]  }
  0x4f   : > { %s1742_s24 = smov [#allocation9]   ;;  %s1635_s29 = scalar_lea.hbm %s2098_s8, 32 }
  0x50   : > { %s309_s25 = sshll.u32 %s1742_s24, 4  ;;  %p1636_p8 = scmp.ne.s32.totalorder %s2098_s8, %s1635_s29  ;;  %s310_s25 = int_to_ptr.vmem [resolvable:$true] %s309_s25 }
  0x51   : > { %p1642_p4 = scmp.lt.u32.totalorder %s1635_s29, %s2098_s8 }
  0x52   : > { %p1638_p10 = pnand %p1636_p8, %p1853_p9 }
  0x54   : > { %p1639_p1 = pneg %p1638_p10 }
  0x56   : > { %p1644_p5 = pnand %p1642_p4, %p1639_p1 }
  0x58   : > { %1647 = shalt.err (!%p1644_p5)
}
  0x59   : > { %s1648_s22 = scalar_lea.vmem %s310_s25, 32  ;;  %p1656_p0 = scmp.lt.s32.totalorder %s310_s25, %s310_s25 }
  0x5a   : > { %p1649_p11 = scmp.ne.s32.totalorder %s310_s25, %s1648_s22  ;;  %p1657_p2 = scmp.lt.s32.totalorder %s1648_s22, %s1648_s22 }
  0x5c   : > { %p1651_p12 = pnand %p1649_p11, %p1853_p9  ;;  %p1658_p3 = por %p1657_p2, %p1656_p0 }
  0x5e   : > { %p1652_p13 = pneg %p1651_p12 }
  0x60   : > { %p1659_p6 = pnand %p1658_p3, %p1652_p13 }
  0x62   : > { %1662 = shalt.err (!%p1659_p6)
}
  0x63   : > { %1487 = dma.hbm_to_vmem [thread:$0]  (!%p1837_p7), %s2098_s8, 32, %s310_s25, [#allocation8]  }
  0x64   : > { %s1930_s28 = sadd.s32 1, %s1735_s12   ;;  %s31_s21 = sadd.s32 1, %s1731_s11 }
  0x65   : > { %s28_s24 = ssub.s32 %s1735_s12, %s1930_s28  ;;  %p38_p9 = scmp.ne.s32.totalorder %s1731_s11, %s1727_s10 }
  0x66   : > { %p29_p8 = scmp.eq.s32.totalorder %s28_s24, 0  ;;  %p39_p10 = scmp.eq.s32.totalorder %s1735_s12, 0 }
  0x67   : > { %p1496_p1 = scmp.lt.s32.totalorder %s1735_s12, 2  ;;  %s320_s20 = sand.u32 1, %s1731_s11  }
  0x68   : > { %s1941_s26 = scalar_select %p29_p8, %s1731_s11, %s31_s21  }
  0x69   : > { %p40_p4 = por %p39_p10, %p38_p9  ;;  %s1272_s27 = sshll.u32 %s320_s20, 4 }
  0x6a   : > { %s1302_s29 = sshll.u32 %s1735_s12, 8  ;;  %s324_s25 = scalar_lea.vmem [#allocation2], %s1272_s27 }
  0x6b   : > { %s1947_s17 = scalar_lea.hbm %s2090_s0, %s1302_s29  ;;  %s331_s23 = sshll.u32 %s324_s25, 4  ;;  %s1953_s23 = int_to_ptr.vmem [resolvable:$true] %s331_s23 }
  0x6c   : > { %p1949_p7 = pnand %p1496_p1, %p40_p4  ;;  %s1955_s12 = scalar_lea.sflag [#allocation3], %s320_s20 }
  0x6d   : > { %s1663_s19 = scalar_lea.hbm %s1947_s17, 256  ;;  %s1668_s24 = scalar_lea.hbm %s2090_s0, 512 }
  0x6e   : > { %p1664_p5 = scmp.ne.s32.totalorder %s1947_s17, %s1663_s19  ;;  %p1665_p11 = pneg %p1949_p7 }
  0x6f   : > { %p1669_p0 = scmp.lt.u32.totalorder %s1947_s17, %s2090_s0  ;;  %p1670_p2 = scmp.lt.u32.totalorder %s1668_s24, %s1663_s19 }
  0x70   : > { %p1666_p12 = pnand %p1665_p11, %p1664_p5  ;;  %p1672_p6 = scmp.lt.u32.totalorder %s1663_s19, %s1947_s17 }
  0x71   : > { %p1671_p3 = por %p1670_p2, %p1669_p0 }
  0x72   : > { %p1667_p13 = pneg %p1666_p12 }
  0x73   : > { %p1673_p9 = por %p1672_p6, %p1671_p3 }
  0x75   : > { %p1674_p8 = pnand %p1673_p9, %p1667_p13 }
  0x77   : > { %1677 = shalt.err (!%p1674_p8)
}
  0x78   : > { %s1678_s20 = scalar_lea.vmem %s1953_s23, 256  ;;  %s1743_s30 = smov [#allocation2]  }
  0x79   : > { %p1679_p10 = scmp.ne.s32.totalorder %s1953_s23, %s1678_s20  ;;  %s1683_s16 = sshll.u32 %s1743_s30, 4  ;;  %s1684_s16 = int_to_ptr.vmem [resolvable:$false] %s1683_s16 }
  0x7a   : > { %s1685_s25 = scalar_lea.vmem %s1684_s16, 512  ;;  %p1686_p5 = scmp.lt.s32.totalorder %s1953_s23, %s1684_s16 }
  0x7b   : > { %p1681_p1 = pnand %p1679_p10, %p1665_p11  ;;  %p1687_p12 = scmp.lt.s32.totalorder %s1685_s25, %s1678_s20 }
  0x7d   : > { %p1682_p4 = pneg %p1681_p1  ;;  %p1688_p0 = por %p1687_p12, %p1686_p5 }
  0x7f   : > { %p1689_p2 = pnand %p1688_p0, %p1682_p4 }
  0x81   : > { %1692 = shalt.err (!%p1689_p2)
}
  0x82   : > { %s1744_s19 = smov 128   ;;  %s1745_s18 = smov 8  }
  0x83   : > { %1491 = dma.hbm_to_vmem [thread:$0]  (!%p1949_p7), %s1947_s17, 256, %s1953_s23, %s1955_s12, %s1744_s19, %s1744_s19, %s1745_s18  }
  0x84   : > { %p2108_p11 = scmp.ne.s32.totalorder %s2104_s15, 0 }
  0x85   : > { %s345_s21 = sand.u32 (!%p2108_p11), 1, %s1727_s10   ;;  %p2109_p13 = scmp.ne.s32.totalorder (!%p2108_p11), %s2103_s14, 0 }
  0x86   : > { %343 = sbr.rel (%p2108_p11) target bundleno = 698 (0x2ba), region = 56  ;;  %s1276_s24 = sshll.u32 (!%p2108_p11), %s345_s21, 4 }
  0x87   : > { %s346_s27 = scalar_lea.sflag (!%p2108_p11), [#allocation3], %s345_s21  ;;  %s349_s29 = scalar_lea.vmem (!%p2108_p11), [#allocation2], %s1276_s24 }
  0x8d   : > { %1710 = dma.done.wait (%p2109_p13), %s346_s27, 256  }
  0x8e   : > { %1712 = vsyncadd (%p2109_p13), %s346_s27, 4294967040  ;;  %p2110_p3 = scmp.eq.s32.totalorder %s1817_s13, 0 }
  0x90   : > { %1714 = dma.done.wait (%p2110_p3), [#allocation5], 32   ;;  %p2111_p6 = pmov %p2110_p3 }
  0x91   : > { %p2112_p7 = pmov %p2110_p3 }
  0x92   : > { %1716 = vsyncadd (%p2111_p6), [#allocation5], 4294967264 }
  0x93   : > { %1718 = dma.done.wait (%p2112_p7), [#allocation8], 12320   ;;  %p2113_p9 = pmov %p2110_p3 }
  0x94   : > { %v407_v0 = vlaneseq  ;;  %vm433_vm0 = vcmask 130048   ;;  %v1283_v2 = vld [vmem:[%s2091_s1 + $0x10] sm:$0xff]  ;;  %v1284_v3 = vld [vmem:[%s2091_s1 + $0x18] sm:$0xff]  ;;  %v428_v8 = vld [vmem:[%s2091_s1] sm:$0xff]  ;;  %p400_p8 = scmp.lt.s32.totalorder %s1817_s13, 1 }
  0x95   : > { %1720 = vsyncadd (%p2113_p9), [#allocation8], 4294954976  ;;  %v405_v4 = vld [vmem:[%s349_s29] sm:$0xff]  ;;  %v1337_v5 = vpack.c.bf16 %v1284_v3, %v1283_v2  ;;  %v406_v7 = vld [vmem:[%s349_s29 + $0x8] sm:$0xff] }
  0x96   : > { %v1998_v1 = vshrl.u32 %v407_v0, 7  ;;  %v412_v6 = vrot.slane %v405_v4, 7  ;;  %1320 = vmatprep.mubr.msk.f32.mxu0 %vm433_vm0, %v405_v4  ;;  %v429_v9 = vld [vmem:[%s2091_s1 + $0x8] sm:$0xff]  ;;  %v413_v10 = vrot.slane %v406_v7, 7  ;;  %v1289_v12 = vld [vmem:[%s2091_s1 + $0x20] sm:$0xff]  ;;  %v421_v17 = vrot.slane %v405_v4, 1 }
  0x97   : > { %v1341_v11 = vpack.c.bf16 %v429_v9, %v428_v8  ;;  %v1290_v13 = vld [vmem:[%s2091_s1 + $0x28] sm:$0xff]  ;;  %1338 = vmatprep.subr.bf16.mxu0 %v1337_v5  ;;  %v422_v18 = vrot.slane %v406_v7, 1  ;;  %v811_v25 = vld [vmem:[#allocation7 + $0x118] sm:$0xff]  ;;  %v810_v28 = vld [vmem:[#allocation7 + $0x110] sm:$0xff]  ;;  %s2119_s13 = smov (!%p400_p8, %s1817_s13), 1 }
  0x98   : > { %vm414_vm1 = vcmp.lt.s32.totalorder %v1998_v1, 1  ;;  %vm410_vm2 = vcmp.eq.s32.totalorder %v1998_v1, 0  ;;  %1340 = vmatpush3.bf16.msra.mxu0 %v1337_v5  ;;  %v1345_v16 = vpack.c.bf16 %v1290_v13, %v1289_v12  ;;  %vm423_vm3 = vcmp.lt.s32.totalorder %v1998_v1, 7  ;;  %v809_v24 = vld [vmem:[#allocation7 + $0x108] sm:$0xff]  ;;  %v808_v27 = vld [vmem:[#allocation7 + $0x100] sm:$0xff]  ;;  %v778_v31 = vld [vmem:[#allocation7 + $0x18] sm:$0xff] }
  0x99   : > { %v416_v14 = vsel %vm414_vm1, %v413_v10, %v412_v6  ;;  %1342 = vmatprep.subr.bf16.mxu0 %v1341_v11  ;;  %v415_v19 = vsel %vm414_vm1, %v412_v6, %v413_v10  ;;  %v424_v20 = vsel %vm423_vm3, %v421_v17, %v422_v18  ;;  %v2033_v21 = vadd.s32 8, %v1998_v1  ;;  %v776_v30 = vld [vmem:[#allocation7 + $0x8] sm:$0xff]  ;;  %v775_v33 = vld [vmem:[#allocation7] sm:$0xff]  ;;  %v777_v34 = vld [vmem:[#allocation7 + $0x10] sm:$0xff]  ;;  %s1303_s14 = sshll.u32 %s2119_s13, 5 }
  0x9a   : > { %v417_v15 = vsel %vm410_vm2, 0.0, %v416_v14  ;;  %v425_v22 = vsel %vm423_vm3, %v422_v18, %v421_v17  ;;  %v1349_v26 = vpack.c.bf16 %v811_v25, %v809_v24  ;;  %v1351_v29 = vpack.c.bf16 %v810_v28, %v808_v27  ;;  %v813_v36 = vld [vmem:[#allocation7 + $0x128] sm:$0xff]  ;;  %v815_v37 = vld [vmem:[#allocation7 + $0x138] sm:$0xff]  ;;  %v812_v39 = vld [vmem:[#allocation7 + $0x120] sm:$0xff]  ;;  %s404_s12 = scalar_lea.vmem %s2099_s9, %s1303_s14 }
  0x9b   : > { %1321 = vmatmul.mubr.msk.f32.vlgmr.msra.gmra.mrb[0].mxu0 %vm433_vm0, %v406_v7  ;;  %vm420_vm4 = vcmp.eq.s32.totalorder %v2033_v21, 15  ;;  %v1381_v32 = vpack.c.bf16 %v778_v31, %v776_v30  ;;  %v1383_v35 = vpack.c.bf16 %v777_v34, %v775_v33  ;;  %v1353_v38 = vpack.c.bf16 %v815_v37, %v813_v36  ;;  %v814_v40 = vld [vmem:[#allocation7 + $0x130] sm:$0xff]  ;;  %v780_v42 = vld [vmem:[#allocation7 + $0x28] sm:$0xff]  ;;  %v782_v43 = vld [vmem:[#allocation7 + $0x38] sm:$0xff] }
  0x9c   : > { %1344 = vmatpush3.bf16.msra.mxu0 %v1341_v11  ;;  %1327 = vmatprep.mubr.msk.f32.mxu0 %vm433_vm0, %v417_v15  ;;  %v427_v23 = vsel %vm420_vm4, 0.0, %v425_v22  ;;  %v1355_v41 = vpack.c.bf16 %v814_v40, %v812_v39  ;;  %v1385_v44 = vpack.c.bf16 %v782_v43, %v780_v42  ;;  %v779_v45 = vld [vmem:[#allocation7 + $0x20] sm:$0xff]  ;;  %v781_v46 = vld [vmem:[#allocation7 + $0x30] sm:$0xff]  ;;  %v817_v48 = vld [vmem:[#allocation7 + $0x148] sm:$0xff] }
  0x9d   : > { %1346 = vmatprep.subr.bf16.mxu0 %v1345_v16  ;;  %1382 = vmatprep.subr.bf16.mxu1 %v1381_v32  ;;  %v1387_v47 = vpack.c.bf16 %v781_v46, %v779_v45  ;;  %v819_v49 = vld [vmem:[#allocation7 + $0x158] sm:$0xff]  ;;  %v816_v51 = vld [vmem:[#allocation7 + $0x140] sm:$0xff]  ;;  %v818_v52 = vld [vmem:[#allocation7 + $0x150] sm:$0xff] }
  0x9e   : > { %1384 = vmatpush1.bf16.msra.mxu1 %v1383_v35  ;;  %v1357_v50 = vpack.c.bf16 %v819_v49, %v817_v48  ;;  %v1359_v53 = vpack.c.bf16 %v818_v52, %v816_v51  ;;  %v784_v54 = vld [vmem:[#allocation7 + $0x48] sm:$0xff]  ;;  %v786_v55 = vld [vmem:[#allocation7 + $0x58] sm:$0xff]  ;;  %v783_v57 = vld [vmem:[#allocation7 + $0x40] sm:$0xff] }
  0x9f   : > { %1386 = vmatprep.subr.bf16.mxu1 %v1385_v44  ;;  %v1389_v56 = vpack.c.bf16 %v786_v55, %v784_v54  ;;  %v785_v58 = vld [vmem:[#allocation7 + $0x50] sm:$0xff]  ;;  %v821_v60 = vld [vmem:[#allocation7 + $0x168] sm:$0xff]  ;;  %v823_v61 = vld [vmem:[#allocation7 + $0x178] sm:$0xff] }
  0xa0   : > { %v1391_v59 = vpack.c.bf16 %v785_v58, %v783_v57  ;;  %v1361_v62 = vpack.c.bf16 %v823_v61, %v821_v60  ;;  %v820_v63 = vld [vmem:[#allocation7 + $0x160] sm:$0xff]  ;;  %v822_v0 = vld [vmem:[#allocation7 + $0x170] sm:$0xff]  ;;  %v788_v3 = vld [vmem:[#allocation7 + $0x68] sm:$0xff]  ;;  %v1746_v58 = vmov 0.0  }
  0xa1   : > { %v1363_v2 = vpack.c.bf16 %v822_v0, %v820_v63  ;;  %v790_v4 = vld [vmem:[#allocation7 + $0x78] sm:$0xff]  ;;  %v787_v6 = vld [vmem:[#allocation7 + $0x60] sm:$0xff]  ;;  %v789_v7 = vld [vmem:[#allocation7 + $0x70] sm:$0xff]  ;;  %981 = vmatprep.mubr.f32.mxu1 %v1746_v58 }
  0xa2   : > { %1388 = vmatpush1.bf16.msra.mxu1 %v1387_v47  ;;  %v1393_v5 = vpack.c.bf16 %v790_v4, %v788_v3  ;;  %v1395_v8 = vpack.c.bf16 %v789_v7, %v787_v6  ;;  %v825_v9 = vld [vmem:[#allocation7 + $0x188] sm:$0xff]  ;;  %v827_v10 = vld [vmem:[#allocation7 + $0x198] sm:$0xff]  ;;  %v824_v12 = vld [vmem:[#allocation7 + $0x180] sm:$0xff] }
  0xa3   : > { %1328 = vmatmul.mubr.msk.f32.vlgmr.msra.gmra.mrb[0].mxu0 %vm433_vm0, %v415_v19  ;;  %1390 = vmatprep.subr.bf16.mxu1 %v1389_v56  ;;  %v1365_v11 = vpack.c.bf16 %v827_v10, %v825_v9  ;;  %v826_v13 = vld [vmem:[#allocation7 + $0x190] sm:$0xff]  ;;  %v792_v15 = vld [vmem:[#allocation7 + $0x88] sm:$0xff]  ;;  %v791_v18 = vld [vmem:[#allocation7 + $0x80] sm:$0xff] }
  0xa4   : > { %1348 = vmatpush3.bf16.msra.mxu0 %v1345_v16  ;;  %1334 = vmatprep.mubr.msk.f32.mxu0 %vm433_vm0, %v424_v20  ;;  %v1367_v14 = vpack.c.bf16 %v826_v13, %v824_v12  ;;  %v794_v16 = vld [vmem:[#allocation7 + $0x98] sm:$0xff]  ;;  %v793_v19 = vld [vmem:[#allocation7 + $0x90] sm:$0xff]  ;;  %v829_v22 = vld [vmem:[#allocation7 + $0x1a8] sm:$0xff] }
  0xa5   : > { %1350 = vmatprep.subr.bf16.mxu0 %v1349_v26  ;;  %v1397_v17 = vpack.c.bf16 %v794_v16, %v792_v15  ;;  %v1399_v20 = vpack.c.bf16 %v793_v19, %v791_v18  ;;  %v828_v25 = vld [vmem:[#allocation7 + $0x1a0] sm:$0xff]  ;;  %v830_v26 = vld [vmem:[#allocation7 + $0x1b0] sm:$0xff]  ;;  %v796_v28 = vld [vmem:[#allocation7 + $0xa8] sm:$0xff] }
  0xa6   : > { %1392 = vmatpush1.bf16.msra.mxu1 %v1391_v59  ;;  %v1371_v27 = vpack.c.bf16 %v830_v26, %v828_v25  ;;  %v795_v31 = vld [vmem:[#allocation7 + $0xa0] sm:$0xff]  ;;  %v797_v32 = vld [vmem:[#allocation7 + $0xb0] sm:$0xff]  ;;  %v833_v34 = vld [vmem:[#allocation7 + $0x1c8] sm:$0xff] }
  0xa7   : > { %1394 = vmatprep.subr.bf16.mxu1 %v1393_v5  ;;  %v1403_v33 = vpack.c.bf16 %v797_v32, %v795_v31  ;;  %v835_v35 = vld [vmem:[#allocation7 + $0x1d8] sm:$0xff]  ;;  %v832_v37 = vld [vmem:[#allocation7 + $0x1c0] sm:$0xff]  ;;  %v800_v40 = vld [vmem:[#allocation7 + $0xc8] sm:$0xff] }
  0xa8   : > { %v1373_v36 = vpack.c.bf16 %v835_v35, %v833_v34  ;;  %v799_v43 = vld [vmem:[#allocation7 + $0xc0] sm:$0xff]  ;;  %v801_v44 = vld [vmem:[#allocation7 + $0xd0] sm:$0xff]  ;;  %v837_v46 = vld [vmem:[#allocation7 + $0x1e8] sm:$0xff] }
  0xa9   : > { %v1407_v45 = vpack.c.bf16 %v801_v44, %v799_v43  ;;  %v839_v47 = vld [vmem:[#allocation7 + $0x1f8] sm:$0xff]  ;;  %v836_v49 = vld [vmem:[#allocation7 + $0x1e0] sm:$0xff]  ;;  %v804_v52 = vld [vmem:[#allocation7 + $0xe8] sm:$0xff] }
  0xaa   : > { %1396 = vmatpush1.bf16.msra.mxu1 %v1395_v8  ;;  %v1377_v48 = vpack.c.bf16 %v839_v47, %v837_v46  ;;  %v803_v55 = vld [vmem:[#allocation7 + $0xe0] sm:$0xff]  ;;  %v805_v56 = vld [vmem:[#allocation7 + $0xf0] sm:$0xff]  ;;  %v996_v59 = vld [vmem:[#allocation7 + $0x208] sm:$0xff] }
  0xab   : > { %1335 = vmatmul.mubr.msk.f32.vlgmr.msra.gmra.mrb[0].mxu0 %vm433_vm0, %v427_v23  ;;  %v831_v23 = vld [vmem:[#allocation7 + $0x1b8] sm:$0xff]  ;;  %1398 = vmatprep.subr.bf16.mxu1 %v1397_v17  ;;  %v1411_v57 = vpack.c.bf16 %v805_v56, %v803_v55  ;;  %vm1296_vm7 = vmneg %vm410_vm2 }
  0xac   : > { %1352 = vmatpush1.bf16.msra.mxu0 %v1351_v29  ;;  %v1369_v24 = vpack.c.bf16 %v831_v23, %v829_v22  ;;  %v798_v29 = vld [vmem:[#allocation7 + $0xb8] sm:$0xff]  ;;  %904 = vmatprep.mubr.f32.mxu0 %v1746_v58  ;;  %vm1298_vm8 = vmneg %vm420_vm4 }
  0xad   : > { %1354 = vmatprep.subr.bf16.mxu0 %v1353_v38  ;;  %v1401_v30 = vpack.c.bf16 %v798_v29, %v796_v28  ;;  %v834_v38 = vld [vmem:[#allocation7 + $0x1d0] sm:$0xff]  ;;  %v998_v60 = vld [vmem:[#allocation7 + $0x218] sm:$0xff] }
  0xae   : > { %1400 = vmatpush1.bf16.msra.mxu1 %v1399_v20  ;;  %v1375_v39 = vpack.c.bf16 %v834_v38, %v832_v37  ;;  %v1413_v61 = vpack.c.bf16 %v998_v60, %v996_v59  ;;  %v1294_v0 = vld [vmem:[#allocation4] ss:$0 sm:$0xff]  ;;  %v1295_v4 = vld [vmem:[#allocation6] ss:$0 sm:$0xff] }
  0xaf   : > { %1402 = vmatprep.subr.bf16.mxu1 %v1401_v30 }
  0xb0   : > { %1356 = vmatpush1.bf16.msra.mxu0 %v1355_v41  ;;  %v802_v41 = vld [vmem:[#allocation7 + $0xd8] sm:$0xff] }
  0xb1   : > { %1358 = vmatprep.subr.bf16.mxu0 %v1357_v50  ;;  %v1405_v42 = vpack.c.bf16 %v802_v41, %v800_v40  ;;  %v838_v50 = vld [vmem:[#allocation7 + $0x1f0] sm:$0xff] }
  0xb2   : > { %1404 = vmatpush1.bf16.msra.mxu1 %v1403_v33  ;;  %v1379_v51 = vpack.c.bf16 %v838_v50, %v836_v49  ;;  %v1747_v50 = vmov -1.0  }
  0xb3   : > { %1406 = vmatprep.subr.bf16.mxu1 %v1405_v42 }
  0xb4   : > { %1360 = vmatpush1.bf16.msra.mxu0 %v1359_v53  ;;  %v806_v53 = vld [vmem:[#allocation7 + $0xf8] sm:$0xff] }
  0xb5   : > { %1362 = vmatprep.subr.bf16.mxu0 %v1361_v62  ;;  %v1409_v54 = vpack.c.bf16 %v806_v53, %v804_v52  ;;  %v1293_v62 = vld [vmem:[%s2092_s2] ss:$0 sm:$0xff] }
  0xb6   : > { %1408 = vmatpush1.bf16.msra.mxu1 %v1407_v45 }
  0xb7   : > { %1410 = vmatprep.subr.bf16.mxu1 %v1409_v54 }
  0xb8   : > { %1364 = vmatpush1.bf16.msra.mxu0 %v1363_v2 }
  0xb9   : > { %1366 = vmatprep.subr.bf16.mxu0 %v1365_v11 }
  0xba   : > { %1412 = vmatpush1.bf16.msra.mxu1 %v1411_v57 }
  0xbb   : > { %1414 = vmatprep.subr.bf16.mxu1 %v1413_v61 }
  0xbc   : > { %1368 = vmatpush1.bf16.msra.mxu0 %v1367_v14 }
  0xbd   : > { %1370 = vmatprep.subr.bf16.mxu0 %v1369_v24 }
  0xc0   : > { %1372 = vmatpush1.bf16.msra.mxu0 %v1371_v27 }
  0xc1   : > { %1374 = vmatprep.subr.bf16.mxu0 %v1373_v36 }
  0xc4   : > { %1376 = vmatpush1.bf16.msra.mxu0 %v1375_v39 }
  0xc5   : > { %1378 = vmatprep.subr.bf16.mxu0 %v1377_v48 }
  0xc8   : > { %1380 = vmatpush1.bf16.msra.mxu0 %v1379_v51 }
 0x17e   : > { %v1336_v63 = vpop.f32.mrb[0].mxu0 }
 0x17f   : > { %v690_v2 = vadd.f32 %v1336_v63, %v1293_v62  ;;  %v671_v3 = vpop.f32.mrb[1].mxu0  ;;  %v997_v63 = vld [vmem:[#allocation7 + $0x210] sm:$0xff] }
 0x180   : > { %v689_v5 = vadd.f32 %v1293_v62, %v671_v3  ;;  %v995_v62 = vld [vmem:[#allocation7 + $0x200] sm:$0xff]  ;;  %v1002_v3 = vld [vmem:[#allocation7 + $0x238] sm:$0xff] }
 0x181   : > { %v699_v6 = vmul.f32 %v1294_v0, %v690_v2  ;;  %v1000_v2 = vld [vmem:[#allocation7 + $0x228] sm:$0xff] }
 0x182   : > { %v698_v7 = vmul.f32 %v1294_v0, %v689_v5 }
 0x183   : > { %v708_v8 = vadd.f32 %v1295_v4, %v699_v6 }
 0x184   : > { %v707_v9 = vadd.f32 %v1295_v4, %v698_v7  ;;  %v1415_v7 = vpack.c.bf16 %v997_v63, %v995_v62  ;;  %v1140_v63 = vld [vmem:[#allocation9] sm:$0x3] }
 0x185   : > { %v710_v10 = vmul.f32 0.70710677, %v708_v8  ;;  %v758_v56 = vmul.f32 0.5, %v708_v8  ;;  %v1417_v8 = vpack.c.bf16 %v1002_v3, %v1000_v2 }
 0x186   : > { %v709_v11 = vmul.f32 0.70710677, %v707_v9  ;;  %v757_v59 = vmul.f32 0.5, %v707_v9  ;;  %v999_v9 = vld [vmem:[#allocation7 + $0x220] sm:$0xff] }
 0x187   : > { %v716_v12 = vand.u32 2147483647, %v710_v10  ;;  %vm712_vm5 = vcmp.ge.f32.partialorder %v710_v10, 0.0 }
 0x188   : > { %v715_v13 = vand.u32 2147483647, %v709_v11  ;;  %vm711_vm6 = vcmp.ge.f32.partialorder %v709_v11, 0.0  ;;  %v714_v51 = vsel %vm712_vm5, 1.0, %v1747_v50  ;;  %v1001_v11 = vld [vmem:[#allocation7 + $0x230] sm:$0xff] }
 0x189   : > { %v718_v14 = vmul.f32 0.3275911, %v716_v12  ;;  %v744_v18 = vsub.f32 0.0, %v716_v12  ;;  %v713_v54 = vsel %vm711_vm6, 1.0, %v1747_v50 }
 0x18a   : > { %v717_v15 = vmul.f32 0.3275911, %v715_v13  ;;  %v743_v19 = vsub.f32 0.0, %v715_v13 }
 0x18b   : > { %v720_v16 = vadd.f32 1.0, %v718_v14  ;;  %v746_v22 = vmul.f32 %v744_v18, %v716_v12  ;;  %v1004_v14 = vld [vmem:[#allocation7 + $0x248] sm:$0xff]  ;;  %v1419_v18 = vpack.c.bf16 %v1001_v11, %v999_v9 }
 0x18c   : > { %v719_v17 = vadd.f32 1.0, %v717_v15  ;;  %v745_v25 = vmul.f32 %v743_v19, %v715_v13  ;;  %v1006_v15 = vld [vmem:[#allocation7 + $0x258] sm:$0xff] }
 0x18d   : > { %1543 = vrcp.f32 %v720_v16  ;;  %v749_v28 = vmul.f32 1.442695, %v746_v22  ;;  %v1421_v19 = vpack.c.bf16 %v1006_v15, %v1004_v14  ;;  %v1005_v22 = vld [vmem:[#allocation7 + $0x250] sm:$0xff] }
 0x18e   : > { %1545 = vrcp.f32 %v719_v17  ;;  %v747_v31 = vmul.f32 1.442695, %v745_v25 }
 0x18f   : > { %1547 = vpow2.f32 %v749_v28  ;;  %v1009_v28 = vld [vmem:[#allocation7 + $0x270] sm:$0xff] }
 0x190   : > { %1549 = vpow2.f32 %v747_v31 }
 0x197   : > { %v1544_v20 = vpop.eup %1543 }
 0x198   : > { %v1546_v23 = vpop.eup %1545  ;;  %v726_v24 = vmul.f32 1.0614054, %v1544_v20 }
 0x199   : > { %v725_v26 = vmul.f32 1.0614054, %v1546_v23  ;;  %v1548_v44 = vpop.eup %1547 }
 0x19a   : > { %v728_v27 = vadd.f32 -1.4531521, %v726_v24  ;;  %v1550_v46 = vpop.eup %1549  ;;  %v1010_v24 = vld [vmem:[#allocation7 + $0x278] sm:$0xff] }
 0x19b   : > { %v727_v29 = vadd.f32 -1.4531521, %v725_v26 }
 0x19c   : > { %v730_v30 = vmul.f32 %v1544_v20, %v728_v27  ;;  %v1007_v27 = vld [vmem:[#allocation7 + $0x260] sm:$0xff] }
 0x19d   : > { %v729_v32 = vmul.f32 %v1546_v23, %v727_v29  ;;  %v1012_v29 = vld [vmem:[#allocation7 + $0x288] sm:$0xff]  ;;  %v1427_v31 = vpack.c.bf16 %v1009_v28, %v1007_v27 }
 0x19e   : > { %v732_v33 = vadd.f32 1.4214138, %v730_v30  ;;  %v1014_v30 = vld [vmem:[#allocation7 + $0x298] sm:$0xff] }
 0x19f   : > { %v731_v34 = vadd.f32 1.4214138, %v729_v32  ;;  %v1429_v32 = vpack.c.bf16 %v1014_v30, %v1012_v29 }
 0x1a0   : > { %v734_v35 = vmul.f32 %v1544_v20, %v732_v33  ;;  %v1011_v33 = vld [vmem:[#allocation7 + $0x280] sm:$0xff] }
 0x1a1   : > { %v733_v36 = vmul.f32 %v1546_v23, %v731_v34  ;;  %v1013_v34 = vld [vmem:[#allocation7 + $0x290] sm:$0xff] }
 0x1a2   : > { %v736_v37 = vadd.f32 -0.28449672, %v734_v35  ;;  %v1016_v35 = vld [vmem:[#allocation7 + $0x2a8] sm:$0xff] }
 0x1a3   : > { %v735_v38 = vadd.f32 -0.28449672, %v733_v36  ;;  %v1018_v36 = vld [vmem:[#allocation7 + $0x2b8] sm:$0xff] }
 0x1a4   : > { %v738_v39 = vmul.f32 %v1544_v20, %v736_v37  ;;  %v1431_v37 = vpack.c.bf16 %v1013_v34, %v1011_v33 }
 0x1a5   : > { %v737_v40 = vmul.f32 %v1546_v23, %v735_v38  ;;  %v1433_v38 = vpack.c.bf16 %v1018_v36, %v1016_v35 }
 0x1a6   : > { %v740_v41 = vadd.f32 0.2548296, %v738_v39  ;;  %v1015_v39 = vld [vmem:[#allocation7 + $0x2a0] sm:$0xff] }
 0x1a7   : > { %v739_v42 = vadd.f32 0.2548296, %v737_v40  ;;  %v1017_v40 = vld [vmem:[#allocation7 + $0x2b0] sm:$0xff] }
 0x1a8   : > { %v742_v43 = vmul.f32 %v1544_v20, %v740_v41  ;;  %v1003_v20 = vld [vmem:[#allocation7 + $0x240] sm:$0xff]  ;;  %v1020_v41 = vld [vmem:[#allocation7 + $0x2c8] sm:$0xff] }
 0x1a9   : > { %v741_v45 = vmul.f32 %v1546_v23, %v739_v42  ;;  %v1008_v23 = vld [vmem:[#allocation7 + $0x268] sm:$0xff]  ;;  %v1423_v25 = vpack.c.bf16 %v1005_v22, %v1003_v20  ;;  %v1022_v42 = vld [vmem:[#allocation7 + $0x2d8] sm:$0xff] }
 0x1aa   : > { %v752_v47 = vmul.f32 %v1548_v44, %v742_v43  ;;  %v1425_v26 = vpack.c.bf16 %v1010_v24, %v1008_v23  ;;  %v1435_v43 = vpack.c.bf16 %v1017_v40, %v1015_v39  ;;  %v1437_v44 = vpack.c.bf16 %v1022_v42, %v1020_v41 }
 0x1ab   : > { %v751_v48 = vmul.f32 %v1550_v46, %v741_v45  ;;  %v1019_v45 = vld [vmem:[#allocation7 + $0x2c0] sm:$0xff]  ;;  %v1021_v46 = vld [vmem:[#allocation7 + $0x2d0] sm:$0xff] }
 0x1ac   : > { %v754_v49 = vsub.f32 1.0, %v752_v47  ;;  %v1024_v47 = vld [vmem:[#allocation7 + $0x2e8] sm:$0xff] }
 0x1ad   : > { %v753_v52 = vsub.f32 1.0, %v751_v48  ;;  %v1026_v48 = vld [vmem:[#allocation7 + $0x2f8] sm:$0xff] }
 0x1ae   : > { %v756_v53 = vmul.f32 %v754_v49, %v714_v51  ;;  %v1439_v49 = vpack.c.bf16 %v1021_v46, %v1019_v45  ;;  %v1441_v50 = vpack.c.bf16 %v1026_v48, %v1024_v47  ;;  %v1023_v51 = vld [vmem:[#allocation7 + $0x2e0] sm:$0xff] }
 0x1af   : > { %v755_v55 = vmul.f32 %v753_v52, %v713_v54  ;;  %v1025_v52 = vld [vmem:[#allocation7 + $0x2f0] sm:$0xff] }
 0x1b0   : > { %v760_v57 = vadd.f32 1.0, %v756_v53  ;;  %v1443_v53 = vpack.c.bf16 %v1025_v52, %v1023_v51 }
 0x1b1   : > { %v759_v60 = vadd.f32 1.0, %v755_v55 }
 0x1b2   : > { %v762_v61 = vmul.f32 %v760_v57, %v758_v56 }
 0x1b3   : > { %v761_v0 = vmul.f32 %v759_v60, %v757_v59  ;;  %v1112_v59 = vsub.s32 0, %v1998_v1  ;;  %v1108_v60 = vld [vmem:[%s2096_s6] sm:$0x3] }
 0x1b4   : > { %v764_v4 = vrot.slane %v762_v61, 7  ;;  %v770_v5 = vrot.slane %v762_v61, 1 }
 0x1b5   : > { %905 = vmatmul.mubr.f32.vlgmr.msra.gmra.mrb[2].mxu0 %v761_v0  ;;  %v763_v6 = vrot.slane %v761_v0, 7  ;;  %v769_v10 = vrot.slane %v761_v0, 1  ;;  %v1113_v21 = vrot.slane %v1108_v60, %v1112_v59 }
 0x1b6   : > { %910 = vmatprep.mubr.f32.mxu0 %v1746_v58 }
 0x1b7   : > { %v766_v12 = vsel %vm414_vm1, %v764_v4, %v763_v6  ;;  %v765_v13 = vsel %vm414_vm1, %v763_v6, %v764_v4  ;;  %v771_v16 = vsel %vm423_vm3, %v769_v10, %v770_v5  ;;  %v772_v17 = vsel %vm423_vm3, %v770_v5, %v769_v10 }
 0x1b8   : > { %1297 = vmatmul.mubr.msk.f32.vlgmr.msra.gmra.mrb[0].mxu1 %vm1296_vm7, %v766_v12  ;;  %v1145_v10 = vrot.slane %v1140_v63, %v1112_v59 }
 0x1b9   : > { %1416 = vmatpush1.bf16.msra.mxu1 %v1415_v7  ;;  %911 = vmatmul.mubr.f32.gmra.mrb[4].mxu0 %v762_v61  ;;  %v1116_v61 = vsub.s32 1, %v1998_v1 }
 0x1ba   : > { %987 = vmatprep.mubr.f32.mxu1 %v1746_v58  ;;  %1418 = vmatprep.subr.bf16.mxu1 %v1417_v8 }
 0x1bb   : > { %v1117_v0 = vrot.slane %v1108_v60, %v1116_v61  ;;  %v1149_v9 = vrot.slane %v1140_v63, %v1116_v61 }
 0x1bc   : > { %988 = vmatmul.mubr.f32.gmra.mrb[2].mxu1 %v765_v13 }
 0x1bd   : > { %1420 = vmatpush1.bf16.msra.mxu1 %v1419_v18  ;;  %1091 = vmatprep.mubr.f32.mxu1 %v1746_v58 }
 0x1be   : > { %1422 = vmatprep.subr.bf16.mxu1 %v1421_v19 }
 0x1c1   : > { %1424 = vmatpush1.bf16.msra.mxu1 %v1423_v25 }
 0x1c2   : > { %1426 = vmatprep.subr.bf16.mxu1 %v1425_v26 }
 0x1c5   : > { %1428 = vmatpush1.bf16.msra.mxu1 %v1427_v31 }
 0x1c6   : > { %1430 = vmatprep.subr.bf16.mxu1 %v1429_v32 }
 0x1c9   : > { %1432 = vmatpush1.bf16.msra.mxu1 %v1431_v37 }
 0x1ca   : > { %1434 = vmatprep.subr.bf16.mxu1 %v1433_v38 }
 0x1cd   : > { %1436 = vmatpush1.bf16.msra.mxu1 %v1435_v43 }
 0x1ce   : > { %1438 = vmatprep.subr.bf16.mxu1 %v1437_v44 }
 0x1d1   : > { %1440 = vmatpush1.bf16.msra.mxu1 %v1439_v49 }
 0x1d2   : > { %1442 = vmatprep.subr.bf16.mxu1 %v1441_v50 }
 0x1d5   : > { %1444 = vmatpush1.bf16.msra.mxu1 %v1443_v53 }
 0x1d8   : > { %1092 = vmatmul.mubr.f32.vlgmr.msra.gmra.mrb[0].mxu1 %v771_v16 }
 0x1d9   : > { %1097 = vmatprep.mubr.f32.mxu1 %v1746_v58  ;;  %v1124_v58 = vld [vmem:[%s2097_s7] sm:$0x3] }
 0x1da   : > { %v1129_v3 = vrot.slane %v1124_v58, %v1112_v59  ;;  %v1133_v6 = vrot.slane %v1124_v58, %v1116_v61 }
 0x1dc   : > { %1299 = vmatmul.mubr.msk.f32.gmra.mrb[2].mxu1 %vm1298_vm8, %v772_v17 }
 0x288   : > { %v906_v54 = vpop.f32.mrb[2].mxu0 }
 0x289   : > { %v908_v55 = vpop.f32.mrb[3].mxu0 }
 0x28c   : > { %v912_v56 = vpop.f32.mrb[4].mxu0 }
 0x28d   : > { %v914_v57 = vpop.f32.mrb[5].mxu0 }
 0x2ab   : > { %v1093_v62 = vpop.f32.mrb[0].mxu1 }
 0x2ac   : > { %v1445_v2 = vadd.f32 %v1093_v62, %v906_v54  ;;  %v1095_v4 = vpop.f32.mrb[1].mxu1 }
 0x2ad   : > { %v1446_v5 = vadd.f32 %v1095_v4, %v908_v55 }
 0x2ae   : > { %v1120_v7 = vadd.f32 %v1445_v2, %v1113_v21 }
 0x2af   : > { %v1121_v8 = vadd.f32 %v1446_v5, %v1117_v0  ;;  %v1099_v1 = vpop.f32.mrb[2].mxu1 }
 0x2b0   : > { %v1136_v11 = vmul.f32 %v1129_v3, %v1120_v7  ;;  %v1447_v12 = vadd.f32 %v1099_v1, %v912_v56  ;;  %v1101_v13 = vpop.f32.mrb[3].mxu1 }
 0x2b1   : > { %v1137_v14 = vmul.f32 %v1133_v6, %v1121_v8  ;;  %v1448_v15 = vadd.f32 %v1101_v13, %v914_v57 }
 0x2b2   : > { %v1152_v16 = vadd.f32 %v1145_v10, %v1136_v11  ;;  %v1122_v17 = vadd.f32 %v1447_v12, %v1113_v21 }
 0x2b3   : > { %v1153_v18 = vadd.f32 %v1149_v9, %v1137_v14  ;;  %v1123_v19 = vadd.f32 %v1448_v15, %v1117_v0 }
 0x2b4   : > { %1156 = vst [vmem:[%s404_s12] sm:$0xff] %v1152_v16  ;;  %v1138_v20 = vmul.f32 %v1129_v3, %v1122_v17 }
 0x2b5   : > { %1157 = vst [vmem:[%s404_s12 + $0x8] sm:$0xff] %v1153_v18  ;;  %v1139_v22 = vmul.f32 %v1133_v6, %v1123_v19 }
 0x2b6   : > { %v1154_v23 = vadd.f32 %v1145_v10, %v1138_v20 }
 0x2b7   : > { %v1155_v24 = vadd.f32 %v1149_v9, %v1139_v22 }
 0x2b8   : > { %1158 = vst [vmem:[%s404_s12 + $0x10] sm:$0xff] %v1154_v23 }
 0x2b9   : > { %1159 = vst [vmem:[%s404_s12 + $0x18] sm:$0xff] %v1155_v24 }
 0x2ba PF: > { %p21_p10 = scmp.ge.s32.totalorder %s1930_s28, 4   ;;  %s2114_s30 = smov %s1727_s10 }
 0x2bb   : > { %s2115_s10 = smov %s1731_s11  ;;  %s2116_s11 = smov %s1941_s26 }
 0x2bc   : > { %s2117_s12 = smov %s1930_s28  ;;  %23 = sbr.rel (!%p21_p10) target bundleno = 5 (0x5), region = 116 }
 0x2c3   :  { %1181 = vsyncpa [#allocation3], 1 }
 0x2c4   :  { %1183 = vsyncpa [#allocation3 + $0x1], 1 }
 0x2c5   :  { %1184 = vsyncpa [#allocation5], 1 }
 0x2c6   :  { %1185 = vsyncpa [#allocation8], 1 }

// kernel: encoder_forward.5
= control target key start
LH: loop header
LB: loop body
LE: loop exit
PB: predicated region body
PF: predicated region fallthrough
CT: control target
= control target key end

     0   :  { %s1052_s18 = smov 0   ;;  %s1054_s19 = smov 0   ;;  %s1175_s0 = inlined_call_operand.vmem [shape: f32[4,2,128], index: 0, kind: input, shape index: {}]   ;;  %s1176_s1 = inlined_call_operand.vmem [shape: bf16[2,128,128], index: 1, kind: input, shape index: {}]   ;;  %s1177_s2 = inlined_call_operand.vmem [shape: f32[2,32,128], index: 2, kind: input, shape index: {}]   ;;  %s1178_s3 = inlined_call_operand.vmem [shape: f32[2,1,128], index: 3, kind: input, shape index: {}]   ;;  %s1179_s4 = inlined_call_operand.vmem [shape: s32[2,1], index: 4, kind: input, shape index: {}]   ;;  %s1180_s5 = inlined_call_operand.vmem [shape: f32[2,4,2,32], index: 5, kind: output, shape index: {}]  }
   0x1   :  { %s1056_s20 = smov 0  }
   0x2 LB: > { %s27_s21 = sadd.s32 1, %s1002_s19  ;;  %p845_p0 = scmp.ge.s32.totalorder %s1006_s20, 1  ;;  %s1006_s20 = sphi %s1056_s20, %s15_s20   ;;  %s1002_s19 = sphi %s1054_s19, %s1182_s19   ;;  %s998_s18 = sphi %s1052_s18, %s1181_s18  }
   0x3   : > { %p29_p1 = scmp.ge.s32.totalorder %s27_s21, 2  ;;  %p260_p2 = scmp.lt.s32.totalorder %s1006_s20, 3 }
   0x5   : > { %s1184_s21 = smov (%p29_p1, %s27_s21), 0  ;;  %p261_p3 = pnand %p845_p0, %p260_p2 }
   0x6   : > { %s365_s22 = ssub.s32 (!%p261_p3), 1, %s998_s18  ;;  %vm374_vm0 = vcmask (!%p261_p3), 254976   ;;  %p331_p4 = scmp.lt.s32.totalorder (!%p261_p3), %s998_s18, 1  ;;  %v1012_v0 = vmov (!%p261_p3), 0.0   ;;  %vm1013_vm1 = vmmov (!%p261_p3), 0   ;;  %v390_v10 = vlaneseq (!%p261_p3) }
   0x7   : > { %264 = sbr.rel (%p261_p3) target bundleno = 988 (0x3dc), region = 40  ;;  %375 = vst.msk [vmem:[#allocation3] sm:$0x3] (!%p261_p3), %vm374_vm0, %v1012_v0  ;;  %376 = vst.msk [vmem:[#allocation4] sm:$0x3] (!%p261_p3), %vm374_vm0, %v1012_v0  ;;  %883 = vmatprep.subr.bf16.mxu0 (!%p261_p3), %v1012_v0  ;;  %899 = vmatprep.mubr.msk.bf16.mxu0 (!%p261_p3), %vm1013_vm1, %v1012_v0 }
   0x8   : > { %v1014_v8 = vmov (!%p261_p3), 1983009808   ;;  %v377_v12 = vld [vmem:[%s1175_s0] sm:$0x3] (!%p261_p3)  ;;  %v378_v13 = vld [vmem:[%s1175_s0 + $0x2] sm:$0x3] (!%p261_p3) }
   0x9   : > { %v388_v9 = vunpack.c.l.s4 (!%p261_p3), %v1014_v8  ;;  %v391_v15 = vshrl.u32 (!%p261_p3), %v390_v10, 7  ;;  %v379_v17 = vld [vmem:[%s1175_s0 + $0x4] sm:$0x3] (!%p261_p3)  ;;  %v380_v18 = vld [vmem:[%s1175_s0 + $0x6] sm:$0x3] (!%p261_p3)  ;;  %v385_v19 = vcombine.low (!%p261_p3), %v377_v12, %v378_v13 }
   0xa   : > { %v386_v20 = vcombine.low (!%p261_p3), %v379_v17, %v380_v18  ;;  %v1126_v29 = vld [vmem:[%s1179_s4] sm:$0x3] (!%p261_p3) }
   0xb   : > { %v389_v14 = vunpack.c.0.s8 (!%p261_p3), %v388_v9 }
   0xd   : > { %v392_v21 = vsub.s32 (!%p261_p3), %v389_v14, %v391_v15 }
   0xe   : > { %s1077_s23 = scalar_select %p331_p4, %s998_s18, 1 }
   0xf   : > { %v393_v23 = vrot.slane %v385_v19, %v392_v21  ;;  %v400_v24 = vrot.slane %v386_v20, %v392_v21 }
  0x10   : > { %s866_s24 = sshll.u32 %s1077_s23, 6  ;;  %s867_s25 = sshll.u32 %s1077_s23, 5 }
  0x11   : > { %s1084_s28 = scalar_lea.vmem %s1176_s1, %s866_s24  ;;  %s340_s6 = scalar_lea.vmem %s1177_s2, %s867_s25  ;;  %v401_v26 = vcombine.low %v393_v23, %v400_v24 }
  0x12   : > { %s868_s7 = sshll.u32 %s1077_s23, 3  ;;  %v962_v1 = vld [vmem:[%s1084_s28] sm:$0xff]   ;;  %v1098_v3 = vld [vmem:[%s340_s6 + $0x8] sm:$0xff]  ;;  %v1100_v4 = vld [vmem:[%s340_s6 + $0x10] sm:$0xff]  ;;  %s343_s30 = scalar_lea.vmem %s1178_s3, %s1077_s23 }
  0x13   : > { %s1094_s10 = scalar_lea.vmem %s1180_s5, %s868_s7  ;;  %v1096_v2 = vld [vmem:[%s340_s6] sm:$0xff]  ;;  %884 = vmatpush3.bf16.msra.mxu0 %v962_v1  ;;  %v1102_v5 = vld [vmem:[%s340_s6 + $0x18] sm:$0xff]  ;;  %v963_v6 = vld [vmem:[%s1084_s28 + $0x8] sm:$0xff]   ;;  %v403_v28 = vpack.c.bf16 %v401_v26, %v401_v26 }
  0x14   : > { %885 = vmatprep.subr.bf16.mxu0 %v1012_v0  ;;  %v964_v7 = vld [vmem:[%s1084_s28 + $0x10] sm:$0xff]   ;;  %v965_v11 = vld [vmem:[%s1084_s28 + $0x18] sm:$0xff]   ;;  %v966_v16 = vld [vmem:[%s1084_s28 + $0x20] sm:$0xff]  }
  0x15   : > { %v967_v22 = vld [vmem:[%s1084_s28 + $0x28] sm:$0xff]   ;;  %v968_v25 = vld [vmem:[%s1084_s28 + $0x30] sm:$0xff]   ;;  %v969_v27 = vld [vmem:[%s1084_s28 + $0x38] sm:$0xff]   ;;  %s1132_s28 = smov 0  }
  0x16   : > { %v860_v31 = vld [vmem:[%s343_s30] ss:$0 sm:$0xff] }
  0x17   : > { %886 = vmatpush3.bf16.msra.mxu0 %v963_v6 }
  0x18   : > { %887 = vmatprep.subr.bf16.mxu0 %v1012_v0 }
  0x1b   : > { %888 = vmatpush3.bf16.msra.mxu0 %v964_v7 }
  0x1c   : > { %889 = vmatprep.subr.bf16.mxu0 %v1012_v0 }
  0x1f   : > { %890 = vmatpush3.bf16.msra.mxu0 %v965_v11 }
  0x20   : > { %891 = vmatprep.subr.bf16.mxu0 %v1012_v0 }
  0x23   : > { %892 = vmatpush3.bf16.msra.mxu0 %v966_v16 }
  0x24   : > { %893 = vmatprep.subr.bf16.mxu0 %v1012_v0 }
  0x27   : > { %894 = vmatpush3.bf16.msra.mxu0 %v967_v22 }
  0x28   : > { %895 = vmatprep.subr.bf16.mxu0 %v1012_v0 }
  0x2b   : > { %896 = vmatpush3.bf16.msra.mxu0 %v968_v25 }
  0x2c   : > { %897 = vmatprep.subr.bf16.mxu0 %v1012_v0 }
  0x2f   : > { %898 = vmatpush3.bf16.msra.mxu0 %v969_v27 }
  0x32   : > { %900 = vmatmul.mubr.bf16.vlgmr.msra.gmra.mrb[0].mxu0 %v403_v28 }
 0x105   : > { %v502_v30 = vpop.f32.mrb[0].mxu0 }
 0x106   : > { %v509_v32 = vcombine.high %v502_v30, %v502_v30  ;;  %v516_v33 = vrot.slane %v502_v30, %v392_v21  ;;  %v901_v34 = vpop.f32.mrb[1].mxu0 }
 0x107   : > { %v505_v35 = vpop.f32.mrb[2].mxu0 }
 0x108   : > { %v523_v36 = vrot.slane %v509_v32, %v392_v21  ;;  %v524_v37 = vcombine.high %v516_v33, %v516_v33  ;;  %v537_v38 = vadd.f32 %v860_v31, %v516_v33  ;;  %v902_v39 = vpop.f32.mrb[3].mxu0 }
 0x10a   : > { %v525_v40 = vcombine.high %v523_v36, %v523_v36  ;;  %v538_v41 = vadd.f32 %v860_v31, %v524_v37  ;;  %v539_v42 = vadd.f32 %v860_v31, %v523_v36  ;;  %541 = vst [vmem:[#allocation2] sm:$0x3] %v537_v38 }
 0x10c   : > { %v540_v43 = vadd.f32 %v860_v31, %v525_v40  ;;  %542 = vst [vmem:[#allocation2 + $0x2] sm:$0x3] %v538_v41  ;;  %543 = vst [vmem:[#allocation2 + $0x4] sm:$0x3] %v539_v42 }
 0x10e   : > { %544 = vst [vmem:[#allocation2 + $0x6] sm:$0x3] %v540_v43 }
 0x10f LB: >> { %v915_v44 = vpack.c.bf16 %v1098_v3, %v1096_v2  ;;  %v1015_v45 = vmov 0.0|0.0   ;;  %v918_v46 = vpack.c.bf16 %v1102_v5, %v1100_v4  ;;  %vm1016_vm2 = vmmov 0   ;;  %v567_v48 = vld [vmem:[#allocation3] sm:$0x3]  ;;  %s557_s23 = ssub.s32 3, %s1010_s28  ;;  %s556_s6 = smul.u32 %s1010_s28, %s365_s22  ;;  %s1010_s28 = sphi %s1132_s28, %s555_s28  }
 0x110   : >> { %914 = vmatprep.subr.bf16.mxu0 %v1015_v45  ;;  %v1017_v47 = vmov 0.0   ;;  %vm569_vm3 = vcmask 261120   ;;  %s558_s7 = smul.u32 %s998_s18, %s557_s23  ;;  %v1018_v53 = vmov 0   ;;  %s1019_s12 = smov 64   ;;  %v568_v55 = vld [vmem:[#allocation4] sm:$0x3] }
 0x111   : >> { %916 = vmatpush3.bf16.msra.mxu0 %v915_v44  ;;  %911 = vmatprep.mubr.msk.f32.mxu0 %vm1016_vm2, %v1017_v47  ;;  %s1020_s13 = smov 32   ;;  %s1021_s14 = smov 96  }
 0x112   : >> { %917 = vmatprep.subr.bf16.mxu0 %v1015_v45  ;;  %s1146_s8 = sadd.s32 %s558_s7, %s556_s6  ;;  %970 = vset.pattern.permute.xlu1 %v1018_v53  ;;  %s555_s28 = sadd.s32 1, %s1010_s28  }
 0x113   : >> { %s861_s9 = sshll.u32 %s1146_s8, 1  ;;  %971 = vset.pattern.permute.xlu0 %v1018_v53  ;;  %v562_v59 = vstv %s1146_s8  ;;  %p552_p5 = scmp.ge.s32.totalorder %s555_s28, 4  }
 0x114   : >> { %s565_s11 = scalar_lea.vmem [#allocation2], %s861_s9  ;;  %vm563_vm4 = vcmp.lt.s32.totalorder %v562_v59, %v1126_v29  ;;  %s698_s15 = scalar_lea.vmem %s1094_s10, %s861_s9 }
 0x115   : >> { %919 = vmatpush3.bf16.msra.mxu0 %v918_v46  ;;  %v566_v49 = vld [vmem:[%s565_s11] sm:$0x3]  ;;  %v672_v63 = vsel %vm563_vm4, 1, %v1018_v53 }
 0x118   : >> { %912 = vmatmul.mubr.msk.f32.vlgmr.msra.gmra.mrb[0].mxu0 %vm569_vm3, %v567_v48 }
 0x1eb   : >> { %v639_v50 = vpop.f32.mrb[0].mxu0 }
 0x1ec   : >> { %v643_v51 = vadd.f32 %v639_v50, %v566_v49  ;;  %v913_v52 = vpop.f32.mrb[1].mxu0 }
 0x1ee   : >> { %972 = vtanh.f32 %v643_v51  ;;  %v863_v56 = vmul.f32 -1.442695, %v643_v51 }
 0x1f0   : >> { %974 = vpow2.f32 %v863_v56 }
 0x1f8   : >> { %v973_v54 = vpop.eup %972 }
 0x1f9   : >> { %657 = vrot.lane.b32.xlu0 %v973_v54, %s1019_s12 }
 0x1fa   : >> { %v975_v57 = vpop.eup %974 }
 0x1fb   : >> { %v647_v58 = vadd.f32 1.0, %v975_v57 }
 0x1fd   : >> { %652 = vrot.lane.b32.xlu0 %v568_v55, %s1020_s13  ;;  %976 = vrcp.f32 %v647_v58 }
 0x207   : >> { %v977_v60 = vpop.eup %976 }
 0x26b   : >> { %v658_v61 = vpop.permute.xlu0 %657 }
 0x26c   : >> { %v660_v62 = vmul.f32 %v977_v60, %v658_v61 }
 0x26e   : >> { %662 = vrot.lane.b32.xlu1 %v660_v62, %s1020_s13 }
 0x26f   : >> { %v653_v0 = vpop.permute.xlu0 %652 }
 0x270   : >> { %v655_v1 = vmul.f32 %v977_v60, %v653_v0 }
 0x272   : >> { %674 = vperm.xlu1 %970, %v672_v63  }
 0x276   : >> { %677 = vrot.lane.b32.xlu1 %v567_v48, %s1021_s14 }
 0x2e0   : >> { %v663_v6 = vpop.permute.xlu1 %662 }
 0x2e1   : >> { %v665_v7 = vadd.f32 %v663_v6, %v655_v1 }
 0x2e3   : >> { %978 = vtanh.f32 %v665_v7 }
 0x2ed   : >> { %v979_v8 = vpop.eup %978 }
 0x2ee   : >> { %668 = vrot.lane.b32.xlu0 %v979_v8, %s1019_s12 }
 0x2f1   : >> { %v675_v9 = vpop.permute.xlu1 %674 }
 0x2f2   : >> { %vm676_vm5 = vcmp.eq.s32.totalorder %v675_v9, 1 }
 0x2f3   : >> { %v687_v10 = vsel %vm676_vm5, %v665_v7, %v653_v0 }
 0x2f4   : >> { %689 = vrot.lane.b32.xlu1 %v687_v10, %s1021_s14 }
 0x2f5   : >> { %v678_v12 = vpop.permute.xlu1 %677 }
 0x360   : >> { %v669_v11 = vpop.permute.xlu0 %668 }
 0x361   : >> { %v671_v13 = vmul.f32 %v977_v60, %v669_v11 }
 0x363   : >> { %v680_v14 = vsel %vm676_vm5, %v671_v13, %v678_v12  ;;  %v693_v16 = vsel %vm676_vm5, %v671_v13, 0.0 }
 0x364   : >> { %682 = vrot.lane.b32.xlu0 %v680_v14, %s1020_s13 }
 0x366   : >> { %v690_v15 = vpop.permute.xlu1 %689 }
 0x367   : >> { %692 = vst.msk [vmem:[#allocation4] sm:$0x3] %vm374_vm0, %v690_v15 }
 0x368   : >> { %695 = vrot.lane.b32.xlu0 %v693_v16, %s1020_s13 }
 0x3d5   : > { %554 = sbr.rel (!%p552_p5) target bundleno = 271 (0x10f), region = 92 }
 0x3d6   : >> { %v683_v17 = vpop.permute.xlu0 %682 }
 0x3d7   : >> { %686 = vst.msk [vmem:[#allocation3] sm:$0x3] %vm374_vm0, %v683_v17 }
 0x3da   : >> { %v696_v18 = vpop.permute.xlu0 %695 }
 0x3db   : >> { %699 = vst.msk [vmem:[%s698_s15] sm:$0x3] %vm374_vm0, %v696_v18 }
 0x3dc PF: > { %s15_s20 = sadd.s32 1, %s1006_s20   ;;  %s1181_s18 = smov %s1002_s19 }
 0x3dd   : > { %p12_p6 = scmp.ge.s32.totalorder %s15_s20, 4   ;;  %s1182_s19 = smov %s1184_s21 }
 0x3df   :  { %14 = sbr.rel (!%p12_p6) target bundleno = 2 (0x2), region = 103 }

// kernel: encoder_forward.4
= control target key start
LH: loop header
LB: loop body
LE: loop exit
PB: predicated region body
PF: predicated region fallthrough
CT: control target
= control target key end

     0   :  { %s1465_s18 = smov 0   ;;  %s1467_s19 = smov 0   ;;  %s1670_s0 = inlined_call_operand.vmem [shape: f32[8,2,512], index: 0, kind: input, shape index: {}]   ;;  %s1671_s1 = inlined_call_operand.vmem [shape: bf16[2,512,128], index: 1, kind: input, shape index: {}]   ;;  %s1672_s2 = inlined_call_operand.vmem [shape: f32[2,32,128], index: 2, kind: input, shape index: {}]   ;;  %s1673_s3 = inlined_call_operand.vmem [shape: f32[2,1,128], index: 3, kind: input, shape index: {}]   ;;  %s1674_s4 = inlined_call_operand.vmem [shape: s32[2,1], index: 4, kind: input, shape index: {}]   ;;  %s1675_s5 = inlined_call_operand.vmem [shape: f32[2,8,2,32], index: 5, kind: output, shape index: {}]  }
   0x1   :  { %s1469_s20 = smov 0  }
   0x2 LB: > { %s27_s21 = sadd.s32 1, %s1416_s19  ;;  %p1185_p0 = scmp.ge.s32.totalorder %s1420_s20, 1  ;;  %s1420_s20 = sphi %s1469_s20, %s15_s20   ;;  %s1416_s19 = sphi %s1467_s19, %s1677_s19   ;;  %s1412_s18 = sphi %s1465_s18, %s1676_s18  }
   0x3   : > { %p29_p1 = scmp.ge.s32.totalorder %s27_s21, 2  ;;  %p261_p2 = scmp.lt.s32.totalorder %s1420_s20, 3 }
   0x5   : > { %s1679_s21 = smov (%p29_p1, %s27_s21), 0  ;;  %p262_p3 = pnand %p1185_p0, %p261_p2 }
   0x6   : > { %p334_p4 = scmp.lt.s32.totalorder (!%p262_p3), %s1412_s18, 1  ;;  %s368_s22 = ssub.s32 (!%p262_p3), 1, %s1412_s18  ;;  %vm377_vm0 = vcmask (!%p262_p3), 254976   ;;  %v403_v0 = vlaneseq (!%p262_p3)  ;;  %v1426_v1 = vmov (!%p262_p3), 0.0   ;;  %v1427_v2 = vmov (!%p262_p3), 1983009808  }
   0x7   : > { %265 = sbr.rel (%p262_p3) target bundleno = 999 (0x3e7), region = 40  ;;  %378 = vst.msk [vmem:[#allocation3] sm:$0x3] (!%p262_p3), %vm377_vm0, %v1426_v1  ;;  %379 = vst.msk [vmem:[#allocation4] sm:$0x3] (!%p262_p3), %vm377_vm0, %v1426_v1  ;;  %v401_v3 = vunpack.c.l.s4 (!%p262_p3), %v1427_v2 }
   0x8   : > { %v404_v4 = vshrl.u32 (!%p262_p3), %v403_v0, 7  ;;  %v1372_v5 = vld [vmem:[%s1670_s0] ss:$8 sps:$4 sm:$0xff] (!%p262_p3)   ;;  %v1374_v6 = vld [vmem:[%s1670_s0 + $0x10] ss:$8 sps:$4 sm:$0xff] (!%p262_p3)  }
   0x9   : > { %v1376_v7 = vld [vmem:[%s1670_s0 + $0x20] ss:$8 sps:$4 sm:$0xff] (!%p262_p3)   ;;  %v402_v8 = vunpack.c.0.s8 (!%p262_p3), %v401_v3  ;;  %v1378_v9 = vld [vmem:[%s1670_s0 + $0x30] ss:$8 sps:$4 sm:$0xff] (!%p262_p3)   ;;  %v1380_v10 = vld [vmem:[%s1670_s0 + $0x4] ss:$8 sps:$4 sm:$0xff] (!%p262_p3)  }
   0xa   : > { %v1381_v11 = vld [vmem:[%s1670_s0 + $0x14] ss:$8 sps:$4 sm:$0xff] (!%p262_p3)   ;;  %v1382_v12 = vld [vmem:[%s1670_s0 + $0x24] ss:$8 sps:$4 sm:$0xff] (!%p262_p3)  }
   0xb   : > { %v1383_v13 = vld [vmem:[%s1670_s0 + $0x34] ss:$8 sps:$4 sm:$0xff] (!%p262_p3)   ;;  %v1528_v15 = vsub.s32 (!%p262_p3), %v402_v8, %v404_v4 }
   0xd   : > { %v1544_v20 = vrot.slane (!%p262_p3), %v1372_v5, %v1528_v15  ;;  %v1547_v21 = vrot.slane (!%p262_p3), %v1374_v6, %v1528_v15  ;;  %v1550_v22 = vrot.slane (!%p262_p3), %v1376_v7, %v1528_v15  ;;  %v1553_v23 = vrot.slane (!%p262_p3), %v1378_v9, %v1528_v15  ;;  %v1617_v7 = vld [vmem:[%s1674_s4] sm:$0x3] (!%p262_p3) }
   0xe   : > { %s1490_s23 = scalar_select %p334_p4, %s1412_s18, 1  ;;  %v1557_v25 = vrot.slane %v1380_v10, %v1528_v15  ;;  %v1560_v26 = vrot.slane %v1381_v11, %v1528_v15  ;;  %v1563_v27 = vrot.slane %v1382_v12, %v1528_v15  ;;  %v1566_v28 = vrot.slane %v1383_v13, %v1528_v15 }
   0xf   : > { %v429_v30 = vcombine.high %v1544_v20, %v1547_v21  ;;  %v465_v31 = vcombine.high %v1550_v22, %v1553_v23  ;;  %v428_v61 = vcombine.low %v1544_v20, %v1547_v21  ;;  %v464_v62 = vcombine.low %v1550_v22, %v1553_v23 }
  0x10   : > { %s1230_s30 = sshll.u32 %s1490_s23, 8  ;;  %s1231_s6 = sshll.u32 %s1490_s23, 5  ;;  %v431_v33 = vcombine.high %v1557_v25, %v1560_v26  ;;  %v467_v34 = vcombine.high %v1563_v27, %v1566_v28  ;;  %v430_v0 = vcombine.low %v1557_v25, %v1560_v26  ;;  %v466_v1 = vcombine.low %v1563_v27, %v1566_v28 }
  0x11   : > { %s1512_s13 = scalar_lea.vmem %s1671_s1, %s1230_s30  ;;  %s343_s16 = scalar_lea.vmem %s1672_s2, %s1231_s6  ;;  %v477_v36 = vpack.c.bf16 %v465_v31, %v429_v30  ;;  %v476_v5 = vpack.c.bf16 %v464_v62, %v428_v61 }
  0x12   : > { %s1232_s29 = sshll.u32 %s1490_s23, 4  ;;  %v1340_v14 = vld [vmem:[%s1512_s13 + $0x40] sm:$0xff]   ;;  %v1537_v17 = vld [vmem:[%s343_s16 + $0x8] sm:$0xff]  ;;  %v1539_v18 = vld [vmem:[%s343_s16 + $0x10] sm:$0xff]  ;;  %v479_v38 = vpack.c.bf16 %v467_v34, %v431_v33  ;;  %v478_v6 = vpack.c.bf16 %v466_v1, %v430_v0  ;;  %s346_s12 = scalar_lea.vmem %s1673_s3, %s1490_s23 }
  0x13   : > { %s1533_s6 = scalar_lea.vmem %s1675_s5, %s1232_s29  ;;  %v1535_v16 = vld [vmem:[%s343_s16] sm:$0xff]  ;;  %1233 = vmatprep.subr.bf16.mxu0 %v1340_v14  ;;  %v1541_v19 = vld [vmem:[%s343_s16 + $0x18] sm:$0xff]  ;;  %v1344_v35 = vld [vmem:[%s1512_s13 + $0x48] sm:$0xff]   ;;  %768 = vmatprep.mubr.bf16.mxu0 %v477_v36  ;;  %s1627_s23 = smov 0  }
  0x14   : > { %v1341_v24 = vld [vmem:[%s1512_s13 + $0xc0] sm:$0xff]   ;;  %v1345_v37 = vld [vmem:[%s1512_s13 + $0xc8] sm:$0xff]   ;;  %809 = vmatprep.mubr.bf16.mxu1 %v479_v38  ;;  %v1348_v41 = vld [vmem:[%s1512_s13 + $0x50] sm:$0xff]  }
  0x15   : > { %v1342_v29 = vld [vmem:[%s1512_s13] sm:$0xff]   ;;  %1255 = vmatprep.subr.bf16.mxu1 %v1341_v24  ;;  %v1346_v39 = vld [vmem:[%s1512_s13 + $0x8] sm:$0xff]   ;;  %v1349_v42 = vld [vmem:[%s1512_s13 + $0xd0] sm:$0xff]  }
  0x16   : > { %v1343_v32 = vld [vmem:[%s1512_s13 + $0x80] sm:$0xff]   ;;  %1234 = vmatpush3.bf16.msra.mxu0 %v1342_v29  ;;  %v1347_v40 = vld [vmem:[%s1512_s13 + $0x88] sm:$0xff]   ;;  %v1350_v43 = vld [vmem:[%s1512_s13 + $0x10] sm:$0xff]  }
  0x17   : > { %1256 = vmatpush3.bf16.msra.mxu1 %v1343_v32  ;;  %1235 = vmatprep.subr.bf16.mxu0 %v1344_v35  ;;  %v1351_v44 = vld [vmem:[%s1512_s13 + $0x90] sm:$0xff]   ;;  %v1352_v45 = vld [vmem:[%s1512_s13 + $0x58] sm:$0xff]   ;;  %v1356_v49 = vld [vmem:[%s1512_s13 + $0x60] sm:$0xff]  }
  0x18   : > { %1257 = vmatprep.subr.bf16.mxu1 %v1345_v37  ;;  %v1353_v46 = vld [vmem:[%s1512_s13 + $0xd8] sm:$0xff]   ;;  %v1357_v50 = vld [vmem:[%s1512_s13 + $0xe0] sm:$0xff]   ;;  %v1360_v53 = vld [vmem:[%s1512_s13 + $0x68] sm:$0xff]  }
  0x19   : > { %v1354_v47 = vld [vmem:[%s1512_s13 + $0x18] sm:$0xff]   ;;  %v1358_v51 = vld [vmem:[%s1512_s13 + $0x20] sm:$0xff]   ;;  %v1361_v54 = vld [vmem:[%s1512_s13 + $0xe8] sm:$0xff]  }
  0x1a   : > { %1236 = vmatpush3.bf16.msra.mxu0 %v1346_v39  ;;  %v1355_v48 = vld [vmem:[%s1512_s13 + $0x98] sm:$0xff]   ;;  %v1359_v52 = vld [vmem:[%s1512_s13 + $0xa0] sm:$0xff]   ;;  %v1362_v55 = vld [vmem:[%s1512_s13 + $0x28] sm:$0xff]  }
  0x1b   : > { %1258 = vmatpush3.bf16.msra.mxu1 %v1347_v40  ;;  %1237 = vmatprep.subr.bf16.mxu0 %v1348_v41  ;;  %v1363_v56 = vld [vmem:[%s1512_s13 + $0xa8] sm:$0xff]   ;;  %v1364_v57 = vld [vmem:[%s1512_s13 + $0x70] sm:$0xff]   ;;  %v1368_v63 = vld [vmem:[%s1512_s13 + $0x78] sm:$0xff]  }
  0x1c   : > { %1259 = vmatprep.subr.bf16.mxu1 %v1349_v42  ;;  %v1365_v58 = vld [vmem:[%s1512_s13 + $0xf0] sm:$0xff]   ;;  %v1369_v2 = vld [vmem:[%s1512_s13 + $0xf8] sm:$0xff]   ;;  %v1224_v26 = vld [vmem:[%s346_s12] ss:$0 sm:$0xff] }
  0x1d   : > { %v1366_v59 = vld [vmem:[%s1512_s13 + $0x30] sm:$0xff]   ;;  %v1370_v3 = vld [vmem:[%s1512_s13 + $0x38] sm:$0xff]  }
  0x1e   : > { %1238 = vmatpush3.bf16.msra.mxu0 %v1350_v43  ;;  %v1367_v60 = vld [vmem:[%s1512_s13 + $0xb0] sm:$0xff]   ;;  %v1371_v4 = vld [vmem:[%s1512_s13 + $0xb8] sm:$0xff]  }
  0x1f   : > { %1260 = vmatpush3.bf16.msra.mxu1 %v1351_v44  ;;  %1239 = vmatprep.subr.bf16.mxu0 %v1352_v45 }
  0x20   : > { %1261 = vmatprep.subr.bf16.mxu1 %v1353_v46 }
  0x22   : > { %1240 = vmatpush3.bf16.msra.mxu0 %v1354_v47 }
  0x23   : > { %1262 = vmatpush3.bf16.msra.mxu1 %v1355_v48  ;;  %1241 = vmatprep.subr.bf16.mxu0 %v1356_v49 }
  0x24   : > { %1263 = vmatprep.subr.bf16.mxu1 %v1357_v50 }
  0x26   : > { %1242 = vmatpush3.bf16.msra.mxu0 %v1358_v51 }
  0x27   : > { %1264 = vmatpush3.bf16.msra.mxu1 %v1359_v52  ;;  %1243 = vmatprep.subr.bf16.mxu0 %v1360_v53 }
  0x28   : > { %1265 = vmatprep.subr.bf16.mxu1 %v1361_v54 }
  0x2a   : > { %1244 = vmatpush3.bf16.msra.mxu0 %v1362_v55 }
  0x2b   : > { %1266 = vmatpush3.bf16.msra.mxu1 %v1363_v56  ;;  %1245 = vmatprep.subr.bf16.mxu0 %v1364_v57 }
  0x2c   : > { %1267 = vmatprep.subr.bf16.mxu1 %v1365_v58 }
  0x2e   : > { %1246 = vmatpush3.bf16.msra.mxu0 %v1366_v59 }
  0x2f   : > { %1268 = vmatpush3.bf16.msra.mxu1 %v1367_v60  ;;  %1247 = vmatprep.subr.bf16.mxu0 %v1368_v63 }
  0x30   : > { %1269 = vmatprep.subr.bf16.mxu1 %v1369_v2 }
  0x32   : > { %1248 = vmatpush3.bf16.msra.mxu0 %v1370_v3 }
  0x33   : > { %1270 = vmatpush3.bf16.msra.mxu1 %v1371_v4 }
  0x35   : > { %769 = vmatmul.mubr.bf16.vlgmr.msra.gmra.mrb[0].mxu0 %v476_v5 }
  0x36   : > { %810 = vmatmul.mubr.bf16.vlgmr.msra.gmra.mrb[0].mxu1 %v478_v6 }
 0x108   : > { %v1249_v8 = vpop.f32.mrb[0].mxu0 }
 0x109   : > { %v1271_v9 = vpop.f32.mrb[0].mxu1  ;;  %v1250_v10 = vpop.f32.mrb[1].mxu0 }
 0x10a   : > { %v1251_v11 = vadd.f32 %v1250_v10, %v1249_v8  ;;  %v1272_v12 = vpop.f32.mrb[1].mxu1  ;;  %v1252_v13 = vpop.f32.mrb[2].mxu0 }
 0x10b   : > { %v1273_v14 = vadd.f32 %v1272_v12, %v1271_v9  ;;  %v1274_v20 = vpop.f32.mrb[2].mxu1  ;;  %v1253_v21 = vpop.f32.mrb[3].mxu0 }
 0x10c   : > { %v1254_v22 = vadd.f32 %v1253_v21, %v1252_v13  ;;  %v1275_v23 = vpop.f32.mrb[3].mxu1 }
 0x10d   : > { %v812_v24 = vadd.f32 %v1273_v14, %v1251_v11  ;;  %v1276_v25 = vadd.f32 %v1275_v23, %v1274_v20 }
 0x10f   : > { %v820_v27 = vcombine.high %v812_v24, %v812_v24  ;;  %v827_v28 = vrot.slane %v812_v24, %v1528_v15  ;;  %v815_v29 = vadd.f32 %v1276_v25, %v1254_v22 }
 0x111   : > { %v834_v30 = vrot.slane %v820_v27, %v1528_v15  ;;  %v835_v31 = vcombine.high %v827_v28, %v827_v28  ;;  %v869_v32 = vadd.f32 %v1224_v26, %v827_v28  ;;  %v837_v33 = vcombine.high %v815_v29, %v815_v29 }
 0x112   : > { %v844_v34 = vrot.slane %v815_v29, %v1528_v15 }
 0x113   : > { %v836_v35 = vcombine.high %v834_v30, %v834_v30  ;;  %v870_v36 = vadd.f32 %v1224_v26, %v835_v31  ;;  %v871_v37 = vadd.f32 %v1224_v26, %v834_v30  ;;  %877 = vst [vmem:[#allocation2] sm:$0x3] %v869_v32  ;;  %v851_v38 = vrot.slane %v837_v33, %v1528_v15 }
 0x114   : > { %v852_v39 = vcombine.high %v844_v34, %v844_v34  ;;  %v873_v40 = vadd.f32 %v1224_v26, %v844_v34 }
 0x115   : > { %v872_v41 = vadd.f32 %v1224_v26, %v836_v35  ;;  %878 = vst [vmem:[#allocation2 + $0x2] sm:$0x3] %v870_v36  ;;  %879 = vst [vmem:[#allocation2 + $0x4] sm:$0x3] %v871_v37  ;;  %v853_v42 = vcombine.high %v851_v38, %v851_v38  ;;  %v875_v43 = vadd.f32 %v1224_v26, %v851_v38 }
 0x116   : > { %v874_v44 = vadd.f32 %v1224_v26, %v852_v39  ;;  %881 = vst [vmem:[#allocation2 + $0x8] sm:$0x3] %v873_v40 }
 0x117   : > { %880 = vst [vmem:[#allocation2 + $0x6] sm:$0x3] %v872_v41  ;;  %v876_v45 = vadd.f32 %v1224_v26, %v853_v42  ;;  %883 = vst [vmem:[#allocation2 + $0xc] sm:$0x3] %v875_v43 }
 0x118   : > { %882 = vst [vmem:[#allocation2 + $0xa] sm:$0x3] %v874_v44 }
 0x119   : > { %884 = vst [vmem:[#allocation2 + $0xe] sm:$0x3] %v876_v45 }
 0x11a LB: >> { %v1294_v15 = vpack.c.bf16 %v1537_v17, %v1535_v16  ;;  %v1428_v46 = vmov 0.0|0.0   ;;  %v1297_v47 = vpack.c.bf16 %v1541_v19, %v1539_v18  ;;  %vm1429_vm1 = vmmov 0   ;;  %v907_v49 = vld [vmem:[#allocation3] sm:$0x3]  ;;  %s897_s13 = ssub.s32 7, %s1424_s23  ;;  %s896_s14 = smul.u32 %s1424_s23, %s368_s22  ;;  %s1424_s23 = sphi %s1627_s23, %s895_s23  }
 0x11b   : >> { %1293 = vmatprep.subr.bf16.mxu0 %v1428_v46  ;;  %v1430_v48 = vmov 0.0   ;;  %vm909_vm2 = vcmask 261120   ;;  %s898_s15 = smul.u32 %s1412_s18, %s897_s13  ;;  %v1431_v54 = vmov 0   ;;  %s1432_s25 = smov 64   ;;  %v908_v56 = vld [vmem:[#allocation4] sm:$0x3] }
 0x11c   : >> { %1295 = vmatpush3.bf16.msra.mxu0 %v1294_v15  ;;  %1290 = vmatprep.mubr.msk.f32.mxu0 %vm1429_vm1, %v1430_v48  ;;  %s1433_s26 = smov 32   ;;  %s1434_s27 = smov 96  }
 0x11d   : >> { %1296 = vmatprep.subr.bf16.mxu0 %v1428_v46  ;;  %s1641_s16 = sadd.s32 %s898_s15, %s896_s14  ;;  %1384 = vset.pattern.permute.xlu1 %v1431_v54  ;;  %s895_s23 = sadd.s32 1, %s1424_s23  }
 0x11e   : >> { %s1225_s17 = sshll.u32 %s1641_s16, 1  ;;  %1385 = vset.pattern.permute.xlu0 %v1431_v54  ;;  %v902_v60 = vstv %s1641_s16  ;;  %p892_p5 = scmp.ge.s32.totalorder %s895_s23, 8  }
 0x11f   : >> { %s905_s24 = scalar_lea.vmem [#allocation2], %s1225_s17  ;;  %vm903_vm3 = vcmp.lt.s32.totalorder %v902_v60, %v1617_v7  ;;  %s1038_s28 = scalar_lea.vmem %s1533_s6, %s1225_s17 }
 0x120   : >> { %1298 = vmatpush3.bf16.msra.mxu0 %v1297_v47  ;;  %v906_v50 = vld [vmem:[%s905_s24] sm:$0x3]  ;;  %v1012_v0 = vsel %vm903_vm3, 1, %v1431_v54 }
 0x123   : >> { %1291 = vmatmul.mubr.msk.f32.vlgmr.msra.gmra.mrb[0].mxu0 %vm909_vm2, %v907_v49 }
 0x1f6   : >> { %v979_v51 = vpop.f32.mrb[0].mxu0 }
 0x1f7   : >> { %v983_v52 = vadd.f32 %v979_v51, %v906_v50  ;;  %v1292_v53 = vpop.f32.mrb[1].mxu0 }
 0x1f9   : >> { %1386 = vtanh.f32 %v983_v52  ;;  %v1227_v57 = vmul.f32 -1.442695, %v983_v52 }
 0x1fb   : >> { %1388 = vpow2.f32 %v1227_v57 }
 0x203   : >> { %v1387_v55 = vpop.eup %1386 }
 0x204   : >> { %997 = vrot.lane.b32.xlu0 %v1387_v55, %s1432_s25 }
 0x205   : >> { %v1389_v58 = vpop.eup %1388 }
 0x206   : >> { %v987_v59 = vadd.f32 1.0, %v1389_v58 }
 0x208   : >> { %992 = vrot.lane.b32.xlu0 %v908_v56, %s1433_s26  ;;  %1390 = vrcp.f32 %v987_v59 }
 0x212   : >> { %v1391_v61 = vpop.eup %1390 }
 0x276   : >> { %v998_v62 = vpop.permute.xlu0 %997 }
 0x277   : >> { %v1000_v63 = vmul.f32 %v1391_v61, %v998_v62 }
 0x279   : >> { %1002 = vrot.lane.b32.xlu1 %v1000_v63, %s1433_s26 }
 0x27a   : >> { %v993_v1 = vpop.permute.xlu0 %992 }
 0x27b   : >> { %v995_v2 = vmul.f32 %v1391_v61, %v993_v1 }
 0x27d   : >> { %1014 = vperm.xlu1 %1384, %v1012_v0  }
 0x281   : >> { %1017 = vrot.lane.b32.xlu1 %v907_v49, %s1434_s27 }
 0x2eb   : >> { %v1003_v3 = vpop.permute.xlu1 %1002 }
 0x2ec   : >> { %v1005_v4 = vadd.f32 %v1003_v3, %v995_v2 }
 0x2ee   : >> { %1392 = vtanh.f32 %v1005_v4 }
 0x2f8   : >> { %v1393_v5 = vpop.eup %1392 }
 0x2f9   : >> { %1008 = vrot.lane.b32.xlu0 %v1393_v5, %s1432_s25 }
 0x2fc   : >> { %v1015_v6 = vpop.permute.xlu1 %1014 }
 0x2fd   : >> { %vm1016_vm4 = vcmp.eq.s32.totalorder %v1015_v6, 1 }
 0x2fe   : >> { %v1027_v8 = vsel %vm1016_vm4, %v1005_v4, %v993_v1 }
 0x2ff   : >> { %1029 = vrot.lane.b32.xlu1 %v1027_v8, %s1434_s27 }
 0x300   : >> { %v1018_v10 = vpop.permute.xlu1 %1017 }
 0x36b   : >> { %v1009_v9 = vpop.permute.xlu0 %1008 }
 0x36c   : >> { %v1011_v11 = vmul.f32 %v1391_v61, %v1009_v9 }
 0x36e   : >> { %v1020_v12 = vsel %vm1016_vm4, %v1011_v11, %v1018_v10  ;;  %v1033_v14 = vsel %vm1016_vm4, %v1011_v11, 0.0 }
 0x36f   : >> { %1022 = vrot.lane.b32.xlu0 %v1020_v12, %s1433_s26 }
 0x371   : >> { %v1030_v13 = vpop.permute.xlu1 %1029 }
 0x372   : >> { %1032 = vst.msk [vmem:[#allocation4] sm:$0x3] %vm377_vm0, %v1030_v13 }
 0x373   : >> { %1035 = vrot.lane.b32.xlu0 %v1033_v14, %s1433_s26 }
 0x3e0   : > { %894 = sbr.rel (!%p892_p5) target bundleno = 282 (0x11a), region = 92 }
 0x3e1   : >> { %v1023_v20 = vpop.permute.xlu0 %1022 }
 0x3e2   : >> { %1026 = vst.msk [vmem:[#allocation3] sm:$0x3] %vm377_vm0, %v1023_v20 }
 0x3e5   : >> { %v1036_v21 = vpop.permute.xlu0 %1035 }
 0x3e6   : >> { %1039 = vst.msk [vmem:[%s1038_s28] sm:$0x3] %vm377_vm0, %v1036_v21 }
 0x3e7 PF: > { %s15_s20 = sadd.s32 1, %s1420_s20   ;;  %s1676_s18 = smov %s1416_s19 }
 0x3e8   : > { %p12_p6 = scmp.ge.s32.totalorder %s15_s20, 4   ;;  %s1677_s19 = smov %s1679_s21 }
 0x3ea   :  { %14 = sbr.rel (!%p12_p6) target bundleno = 2 (0x2), region = 103 }

</bundles_post_ra>
